<compile_context>
chip_gen: v7x
topology: tpu7x:2x2x1
jax: 0.10.0
libtpu: 0.0.40
codegen_flags: <defaults>
</compile_context>

<pallas_src>
import functools

import jax
import jax.numpy as jnp
import numpy as np
from jax import lax
from jax.experimental import pallas as pl
from jax.experimental.pallas import tpu as pltpu


def _attention_kernel(x_ref, wth_ref, wpi_ref, wg_ref, wz_ref,
                      z_ref, sum_ref, sq_ref, *, num_c, num_head, tq):
    """Per (batch b, query-tile qi) grid point.

    x_ref  : (1, C_in, HW)        input activations (flattened spatial, lane-dense)
    wth_ref: (NH*NC, C_in)        theta_conv weights (all heads)
    wpi_ref: (NH*NC, C_in)        pi_conv weights   (all heads)
    wg_ref : (NH*NC, C_in)        g_conv weights    (all heads)
    wz_ref : (C_in, NH*NC)        z_conv weights
    z_ref  : (1, C_in, tq)        pre-BN z output tile
    sum_ref: (1, 1, C_in, 1)      per-(batch, tile) channel sum of z
    sq_ref : (1, 1, C_in, 1)      per-(batch, tile) channel sum of z^2
    """
    qi = pl.program_id(1)

    x = x_ref[0]                       # (C_in, HW) f32
    w_th = wth_ref[...]                # (NHC, C_in)
    w_pi = wpi_ref[...]
    w_g = wg_ref[...]
    w_z = wz_ref[...]                  # (C_in, NHC)

    hw = x.shape[1]

    # All heads' 1x1 convs at once; HW stays on the lane axis.
    theta_all = jnp.dot(w_th, x, preferred_element_type=jnp.float32)   # (NHC, HW)
    pi_all = jnp.dot(w_pi, x, preferred_element_type=jnp.float32)      # (NHC, HW)
    g_all = jnp.dot(w_g, x, preferred_element_type=jnp.float32)        # (NHC, HW)

    if tq == hw:                       # no query tiling
        theta_q = theta_all
    else:
        q0 = pl.multiple_of(qi * tq, tq)
        theta_q = lax.dynamic_slice_in_dim(theta_all, q0, tq, axis=1)  # (NHC, tq)

    z_acc = None
    for h in range(num_head):          # static unroll; num_head is small
        lo, hi = h * num_c, (h + 1) * num_c
        th_h = theta_q[lo:hi].astype(jnp.bfloat16)    # (num_c, tq)
        pi_h = pi_all[lo:hi].astype(jnp.bfloat16)     # (num_c, HW)
        g_h = g_all[lo:hi].astype(jnp.bfloat16)       # (num_c, HW)

        # scores with keys on sublanes, queries on lanes: s_t[k, q]
        s_t = lax.dot_general(pi_h, th_h, (((0,), (0,)), ((), ())),
                              preferred_element_type=jnp.float32)      # (HW, tq)

        # softmax over keys (axis 0), normalization deferred
        m = jnp.max(s_t, axis=0, keepdims=True)                        # (1, tq) f32
        p = jnp.exp(s_t - m)                                           # (HW, tq) f32
        denom = jnp.sum(p, axis=0, keepdims=True)                      # (1, tq) f32
        inv = pl.reciprocal(denom, approx=True)                        # (1, tq)

        # attended values, then apply the deferred normalization on the small
        # (num_c, tq) result instead of the (HW, tq) probability matrix.
        out_h = jnp.dot(g_h, p.astype(jnp.bfloat16),
                        preferred_element_type=jnp.float32)            # (num_c, tq)
        out_h = out_h * inv

        # z_conv contribution of this head (kept f32): (C_in, tq)
        z_h = jnp.dot(w_z[:, lo:hi], out_h, preferred_element_type=jnp.float32)
        z_acc = z_h if z_acc is None else z_acc + z_h

    z_ref[0] = z_acc

    # per-(batch, tile) channel statistics so BatchNorm never re-reads z from HBM
    sum_ref[0, 0] = jnp.sum(z_acc, axis=1, keepdims=True)              # (C_in, 1)
    sq_ref[0, 0] = jnp.sum(z_acc * z_acc, axis=1, keepdims=True)       # (C_in, 1)


def _pick_tq(hw):
    """Query-tile size: full HW when small, else a 128-aligned divisor."""
    if hw <= 1024:
        return hw
    for cand in (512, 256, 128):
        if hw % cand == 0:
            return cand
    return hw


def _vmem_estimate_bytes(c_in, nhc, hw, tq):
    est = 2 * c_in * hw * 4            # x (double-buffered)
    est += 2 * c_in * tq * 4           # z output tile (double-buffered)
    est += 3 * nhc * hw * 4            # theta / pi / g (f32)
    est += 3 * nhc * hw * 2            # bf16 copies
    est += 3 * hw * tq * 4             # s_t, p (+ temps headroom)
    return est


def attention_forward(x, w_theta, w_pi, w_g, w_z, bn_gamma, bn_beta,
                      *, num_c, num_head, eps=1e-5):
    B, C_in, H, W = x.shape
    HW = H * W
    NHC = num_head * num_c
    x_flat = x.reshape(B, C_in, HW).astype(jnp.float32)

    tq = _pick_tq(HW)
    nq = HW // tq

    kernel = functools.partial(_attention_kernel,
                               num_c=num_c, num_head=num_head, tq=tq)

    # Raise the scoped-VMEM limit only if needed (capped; note v7x has 64 MiB
    # physical, but the query tiling keeps the requirement small anyway).
    vmem = min(96 << 20,
               max(32 << 20, int(1.5 * _vmem_estimate_bytes(C_in, NHC, HW, tq))))

    z, zsum, zsq = pl.pallas_call(
        kernel,
        out_shape=(
            jax.ShapeDtypeStruct((B, C_in, HW), jnp.float32),
            jax.ShapeDtypeStruct((B, nq, C_in, 1), jnp.float32),
            jax.ShapeDtypeStruct((B, nq, C_in, 1), jnp.float32),
        ),
        grid_spec=pltpu.PrefetchScalarGridSpec(
            num_scalar_prefetch=0,
            grid=(B, nq),
            in_specs=[
                pl.BlockSpec((1, C_in, HW), lambda b, q: (b, 0, 0)),
                pl.BlockSpec((NHC, C_in), lambda b, q: (0, 0)),
                pl.BlockSpec((NHC, C_in), lambda b, q: (0, 0)),
                pl.BlockSpec((NHC, C_in), lambda b, q: (0, 0)),
                pl.BlockSpec((C_in, NHC), lambda b, q: (0, 0)),
            ],
            out_specs=[
                pl.BlockSpec((1, C_in, tq), lambda b, q: (b, 0, q)),
                pl.BlockSpec((1, 1, C_in, 1), lambda b, q: (b, q, 0, 0)),
                pl.BlockSpec((1, 1, C_in, 1), lambda b, q: (b, q, 0, 0)),
            ],
        ),
        compiler_params=pltpu.CompilerParams(
            dimension_semantics=("parallel", "parallel"),
            vmem_limit_bytes=vmem),
    )(x_flat,
      w_theta.reshape(NHC, C_in),
      w_pi.reshape(NHC, C_in),
      w_g.reshape(NHC, C_in),
      w_z.reshape(C_in, NHC))

    # BatchNorm2d (training-mode batch statistics, biased variance) fused with the
    # affine transform and the residual add in a single elementwise pass.
    count = float(B * HW)
    mean = jnp.sum(zsum, axis=(0, 1, 3)) / count          # (C_in,)
    ex2 = jnp.sum(zsq, axis=(0, 1, 3)) / count            # (C_in,)
    var = ex2 - mean * mean
    inv_std = lax.rsqrt(var + eps)
    scale = (bn_gamma * inv_std).reshape(1, C_in, 1, 1)
    shift = (bn_beta - mean * bn_gamma * inv_std).reshape(1, C_in, 1, 1)

    z4 = z.reshape(B, C_in, H, W)
    return x + z4 * scale + shift


def _reference(x, w_theta, w_pi, w_g, w_z, gamma, beta, num_c, num_head, eps=1e-5):
    """Pure-JAX f32 reference mirroring the PyTorch forward."""
    B, C_in, H, W = x.shape
    HW = H * W
    xf = x.reshape(B, C_in, HW)

    def conv1x1(w):  # (out, C_in)
        return jnp.einsum('oc,bch->boh', w, xf)

    th = conv1x1(w_theta).reshape(B * num_head, num_c, HW)
    pi = conv1x1(w_pi).reshape(B * num_head, num_c, HW)
    g = conv1x1(w_g).reshape(B * num_head, num_c, HW)
    th_t = jnp.transpose(th, (0, 2, 1))          # (BH, HW, num_c)
    g_t = jnp.transpose(g, (0, 2, 1))            # (BH, HW, num_c)
    att = jnp.einsum('bnc,bcm->bnm', th_t, pi)   # (BH, HW, HW)
    att = jax.nn.softmax(att, axis=-1)
    og = jnp.einsum('bnm,bmc->bnc', att, g_t)    # (BH, HW, num_c)
    og = jnp.transpose(og, (0, 2, 1)).reshape(B, num_head * num_c, HW)
    z = jnp.einsum('oc,bch->boh', w_z, og).reshape(B, C_in, H, W)
    mean = jnp.mean(z, axis=(0, 2, 3), keepdims=True)
    var = jnp.mean((z - mean) ** 2, axis=(0, 2, 3), keepdims=True)
    z_bn = (z - mean) * lax.rsqrt(var + eps)
    z_bn = z_bn * gamma.reshape(1, -1, 1, 1) + beta.reshape(1, -1, 1, 1)
    return x + z_bn


if __name__ == "__main__":
    key = jax.random.PRNGKey(0)
    B, C_in, H, W = 2, 4, 16, 16
    num_c, num_head = 8, 2

    k1, k2, k3, k4, k5 = jax.random.split(key, 5)
    x = jax.random.normal(k1, (B, C_in, H, W), jnp.float32)
    # 1x1 conv weights as matrices (PyTorch (out, in, 1, 1) -> (out, in))
    w_theta = 0.1 * jax.random.normal(k2, (num_c * num_head, C_in), jnp.float32)
    w_pi = 0.1 * jax.random.normal(k3, (num_c * num_head, C_in), jnp.float32)
    w_g = 0.1 * jax.random.normal(k4, (num_c * num_head, C_in), jnp.float32)
    w_z = 0.1 * jax.random.normal(k5, (C_in, num_c * num_head), jnp.float32)
    bn_gamma = jnp.ones((C_in,), jnp.float32)
    bn_beta = jnp.zeros((C_in,), jnp.float32)

    out = attention_forward(x, w_theta, w_pi, w_g, w_z, bn_gamma, bn_beta,
                            num_c=num_c, num_head=num_head)
    out = jax.block_until_ready(out)

    ref = _reference(x, w_theta, w_pi, w_g, w_z, bn_gamma, bn_beta, num_c, num_head)
    # bf16 score / p@g matmuls introduce ~1e-2-level differences in attention
    # weights (accepted in the perf review); max/denominator/z stay f32.
    np.testing.assert_allclose(np.asarray(out), np.asarray(ref), rtol=3e-2, atol=3e-2)

    print("KERNEL_OK")
</pallas_src>

<mosaic_0001>
module attributes {stable_mosaic.version = 11 : i64} {
  func.func @_attention_kernel(%arg0: i32, %arg1: i32, %arg2: memref<1x4x256xf32, #tpu.memory_space<vmem>>, %arg3: memref<16x4xf32, #tpu.memory_space<vmem>>, %arg4: memref<16x4xf32, #tpu.memory_space<vmem>>, %arg5: memref<16x4xf32, #tpu.memory_space<vmem>>, %arg6: memref<4x16xf32, #tpu.memory_space<vmem>>, %arg7: memref<1x4x256xf32, #tpu.memory_space<vmem>>, %arg8: memref<1x1x4x1xf32, #tpu.memory_space<vmem>>, %arg9: memref<1x1x4x1xf32, #tpu.memory_space<vmem>>) attributes {dimension_semantics = [#tpu.dimension_semantics<parallel>, #tpu.dimension_semantics<parallel>], iteration_bounds = array<i64: 2, 1>, scalar_prefetch = 0 : i64, scratch_operands = 0 : i64, tpu.core_type = #tpu.core_type<tc>, window_params = [{transform_indices = @transform_0, window_bounds = array<i64: 1, 4, 256>}, {pipeline_mode = #tpu.pipeline_mode<synchronous>, transform_indices = @transform_1, window_bounds = array<i64: 16, 4>}, {pipeline_mode = #tpu.pipeline_mode<synchronous>, transform_indices = @transform_2, window_bounds = array<i64: 16, 4>}, {pipeline_mode = #tpu.pipeline_mode<synchronous>, transform_indices = @transform_3, window_bounds = array<i64: 16, 4>}, {pipeline_mode = #tpu.pipeline_mode<synchronous>, transform_indices = @transform_4, window_bounds = array<i64: 4, 16>}, {transform_indices = @transform_5, window_bounds = array<i64: 1, 4, 256>}, {transform_indices = @transform_6, window_bounds = array<i64: 1, 1, 4, 1>}, {transform_indices = @transform_7, window_bounds = array<i64: 1, 1, 4, 1>}]} {
    %c0 = arith.constant 0 : index
    %c0_0 = arith.constant 0 : index
    %c0_1 = arith.constant 0 : index
    %0 = vector.load %arg2[%c0, %c0_0, %c0_1] : memref<1x4x256xf32, #tpu.memory_space<vmem>>, vector<1x4x256xf32>
    %1 = vector.shape_cast %0 : vector<1x4x256xf32> to vector<4x256xf32>
    %c0_2 = arith.constant 0 : index
    %c0_3 = arith.constant 0 : index
    %2 = vector.load %arg3[%c0_2, %c0_3] : memref<16x4xf32, #tpu.memory_space<vmem>>, vector<16x4xf32>
    %c0_4 = arith.constant 0 : index
    %c0_5 = arith.constant 0 : index
    %3 = vector.load %arg4[%c0_4, %c0_5] : memref<16x4xf32, #tpu.memory_space<vmem>>, vector<16x4xf32>
    %c0_6 = arith.constant 0 : index
    %c0_7 = arith.constant 0 : index
    %4 = vector.load %arg5[%c0_6, %c0_7] : memref<16x4xf32, #tpu.memory_space<vmem>>, vector<16x4xf32>
    %c0_8 = arith.constant 0 : index
    %c0_9 = arith.constant 0 : index
    %5 = vector.load %arg6[%c0_8, %c0_9] : memref<4x16xf32, #tpu.memory_space<vmem>>, vector<4x16xf32>
    %cst = arith.constant dense<0.000000e+00> : vector<16x256xf32>
    %6 = tpu.matmul %2, %1, %cst {dimension_numbers = #tpu.dot_dimension_numbers<[1], [0], [0], [1], [0, 0, 1, 1], [], []>} : vector<16x4xf32>, vector<4x256xf32>, vector<16x256xf32> -> vector<16x256xf32>
    %cst_10 = arith.constant dense<0.000000e+00> : vector<16x256xf32>
    %7 = tpu.matmul %3, %1, %cst_10 {dimension_numbers = #tpu.dot_dimension_numbers<[1], [0], [0], [1], [0, 0, 1, 1], [], []>} : vector<16x4xf32>, vector<4x256xf32>, vector<16x256xf32> -> vector<16x256xf32>
    %cst_11 = arith.constant dense<0.000000e+00> : vector<16x256xf32>
    %8 = tpu.matmul %4, %1, %cst_11 {dimension_numbers = #tpu.dot_dimension_numbers<[1], [0], [0], [1], [0, 0, 1, 1], [], []>} : vector<16x4xf32>, vector<4x256xf32>, vector<16x256xf32> -> vector<16x256xf32>
    %9 = vector.extract_strided_slice %6 {offsets = [0, 0], sizes = [8, 256], strides = [1, 1]} : vector<16x256xf32> to vector<8x256xf32>
    %10 = arith.truncf %9 : vector<8x256xf32> to vector<8x256xbf16>
    %11 = vector.extract_strided_slice %7 {offsets = [0, 0], sizes = [8, 256], strides = [1, 1]} : vector<16x256xf32> to vector<8x256xf32>
    %12 = arith.truncf %11 : vector<8x256xf32> to vector<8x256xbf16>
    %13 = vector.extract_strided_slice %8 {offsets = [0, 0], sizes = [8, 256], strides = [1, 1]} : vector<16x256xf32> to vector<8x256xf32>
    %14 = arith.truncf %13 : vector<8x256xf32> to vector<8x256xbf16>
    %cst_12 = arith.constant dense<0.000000e+00> : vector<256x256xf32>
    %15 = tpu.matmul %12, %10, %cst_12 {dimension_numbers = #tpu.dot_dimension_numbers<[0], [0], [1], [1], [0, 1, 1, 1], [], []>} : vector<8x256xbf16>, vector<8x256xbf16>, vector<256x256xf32> -> vector<256x256xf32>
    %cst_13 = arith.constant dense<0xFF800000> : vector<256xf32>
    %16 = vector.multi_reduction <maximumf>, %15, %cst_13 [0] : vector<256x256xf32> to vector<256xf32>
    %17 = vector.shape_cast %16 : vector<256xf32> to vector<1x256xf32>
    %18 = vector.broadcast %17 : vector<1x256xf32> to vector<256x256xf32>
    %19 = arith.subf %15, %18 : vector<256x256xf32>
    %20 = math.exp %19 : vector<256x256xf32>
    %cst_14 = arith.constant dense<0.000000e+00> : vector<256xf32>
    %21 = vector.multi_reduction <add>, %20, %cst_14 [0] : vector<256x256xf32> to vector<256xf32>
    %22 = vector.shape_cast %21 : vector<256xf32> to vector<1x256xf32>
    %23 = tpu.reciprocal %22 {approx = true} : vector<1x256xf32> -> vector<1x256xf32>
    %24 = arith.truncf %20 : vector<256x256xf32> to vector<256x256xbf16>
    %cst_15 = arith.constant dense<0.000000e+00> : vector<8x256xf32>
    %25 = tpu.matmul %14, %24, %cst_15 {dimension_numbers = #tpu.dot_dimension_numbers<[1], [0], [0], [1], [0, 0, 1, 1], [], []>} : vector<8x256xbf16>, vector<256x256xbf16>, vector<8x256xf32> -> vector<8x256xf32>
    %26 = vector.broadcast %23 : vector<1x256xf32> to vector<8x256xf32>
    %27 = arith.mulf %25, %26 : vector<8x256xf32>
    %28 = vector.extract_strided_slice %5 {offsets = [0, 0], sizes = [4, 8], strides = [1, 1]} : vector<4x16xf32> to vector<4x8xf32>
    %cst_16 = arith.constant dense<0.000000e+00> : vector<4x256xf32>
    %29 = tpu.matmul %28, %27, %cst_16 {dimension_numbers = #tpu.dot_dimension_numbers<[1], [0], [0], [1], [0, 0, 1, 1], [], []>} : vector<4x8xf32>, vector<8x256xf32>, vector<4x256xf32> -> vector<4x256xf32>
    %30 = vector.extract_strided_slice %6 {offsets = [8, 0], sizes = [8, 256], strides = [1, 1]} : vector<16x256xf32> to vector<8x256xf32>
    %31 = arith.truncf %30 : vector<8x256xf32> to vector<8x256xbf16>
    %32 = vector.extract_strided_slice %7 {offsets = [8, 0], sizes = [8, 256], strides = [1, 1]} : vector<16x256xf32> to vector<8x256xf32>
    %33 = arith.truncf %32 : vector<8x256xf32> to vector<8x256xbf16>
    %34 = vector.extract_strided_slice %8 {offsets = [8, 0], sizes = [8, 256], strides = [1, 1]} : vector<16x256xf32> to vector<8x256xf32>
    %35 = arith.truncf %34 : vector<8x256xf32> to vector<8x256xbf16>
    %cst_17 = arith.constant dense<0.000000e+00> : vector<256x256xf32>
    %36 = tpu.matmul %33, %31, %cst_17 {dimension_numbers = #tpu.dot_dimension_numbers<[0], [0], [1], [1], [0, 1, 1, 1], [], []>} : vector<8x256xbf16>, vector<8x256xbf16>, vector<256x256xf32> -> vector<256x256xf32>
    %cst_18 = arith.constant dense<0xFF800000> : vector<256xf32>
    %37 = vector.multi_reduction <maximumf>, %36, %cst_18 [0] : vector<256x256xf32> to vector<256xf32>
    %38 = vector.shape_cast %37 : vector<256xf32> to vector<1x256xf32>
    %39 = vector.broadcast %38 : vector<1x256xf32> to vector<256x256xf32>
    %40 = arith.subf %36, %39 : vector<256x256xf32>
    %41 = math.exp %40 : vector<256x256xf32>
    %cst_19 = arith.constant dense<0.000000e+00> : vector<256xf32>
    %42 = vector.multi_reduction <add>, %41, %cst_19 [0] : vector<256x256xf32> to vector<256xf32>
    %43 = vector.shape_cast %42 : vector<256xf32> to vector<1x256xf32>
    %44 = tpu.reciprocal %43 {approx = true} : vector<1x256xf32> -> vector<1x256xf32>
    %45 = arith.truncf %41 : vector<256x256xf32> to vector<256x256xbf16>
    %cst_20 = arith.constant dense<0.000000e+00> : vector<8x256xf32>
    %46 = tpu.matmul %35, %45, %cst_20 {dimension_numbers = #tpu.dot_dimension_numbers<[1], [0], [0], [1], [0, 0, 1, 1], [], []>} : vector<8x256xbf16>, vector<256x256xbf16>, vector<8x256xf32> -> vector<8x256xf32>
    %47 = vector.broadcast %44 : vector<1x256xf32> to vector<8x256xf32>
    %48 = arith.mulf %46, %47 : vector<8x256xf32>
    %49 = vector.extract_strided_slice %5 {offsets = [0, 8], sizes = [4, 8], strides = [1, 1]} : vector<4x16xf32> to vector<4x8xf32>
    %cst_21 = arith.constant dense<0.000000e+00> : vector<4x256xf32>
    %50 = tpu.matmul %49, %48, %cst_21 {dimension_numbers = #tpu.dot_dimension_numbers<[1], [0], [0], [1], [0, 0, 1, 1], [], []>} : vector<4x8xf32>, vector<8x256xf32>, vector<4x256xf32> -> vector<4x256xf32>
    %51 = arith.addf %29, %50 : vector<4x256xf32>
    %c0_22 = arith.constant 0 : index
    %c0_23 = arith.constant 0 : index
    %c0_24 = arith.constant 0 : index
    %52 = vector.load %arg7[%c0_22, %c0_23, %c0_24] : memref<1x4x256xf32, #tpu.memory_space<vmem>>, vector<1x4x256xf32>
    %53 = vector.shape_cast %52 : vector<1x4x256xf32> to vector<4x256xf32>
    %54 = vector.shape_cast %51 : vector<4x256xf32> to vector<1x4x256xf32>
    tpu.vector_store %arg7[%c0_22, %c0_23, %c0_24], %54 {strides = array<i32>} : memref<1x4x256xf32, #tpu.memory_space<vmem>>, vector<1x4x256xf32>,
    %cst_25 = arith.constant dense<0.000000e+00> : vector<4xf32>
    %55 = vector.multi_reduction <add>, %51, %cst_25 [1] : vector<4x256xf32> to vector<4xf32>
    %56 = vector.shape_cast %55 : vector<4xf32> to vector<4x1xf32>
    %c0_26 = arith.constant 0 : index
    %c0_27 = arith.constant 0 : index
    %c0_28 = arith.constant 0 : index
    %c0_29 = arith.constant 0 : index
    %57 = vector.load %arg8[%c0_26, %c0_27, %c0_28, %c0_29] : memref<1x1x4x1xf32, #tpu.memory_space<vmem>>, vector<1x1x4x1xf32>
    %58 = vector.shape_cast %57 : vector<1x1x4x1xf32> to vector<4x1xf32>
    %59 = vector.shape_cast %56 : vector<4x1xf32> to vector<1x1x4x1xf32>
    tpu.vector_store %arg8[%c0_26, %c0_27, %c0_28, %c0_29], %59 {strides = array<i32>} : memref<1x1x4x1xf32, #tpu.memory_space<vmem>>, vector<1x1x4x1xf32>,
    %60 = arith.mulf %51, %51 : vector<4x256xf32>
    %cst_30 = arith.constant dense<0.000000e+00> : vector<4xf32>
    %61 = vector.multi_reduction <add>, %60, %cst_30 [1] : vector<4x256xf32> to vector<4xf32>
    %62 = vector.shape_cast %61 : vector<4xf32> to vector<4x1xf32>
    %c0_31 = arith.constant 0 : index
    %c0_32 = arith.constant 0 : index
    %c0_33 = arith.constant 0 : index
    %c0_34 = arith.constant 0 : index
    %63 = vector.load %arg9[%c0_31, %c0_32, %c0_33, %c0_34] : memref<1x1x4x1xf32, #tpu.memory_space<vmem>>, vector<1x1x4x1xf32>
    %64 = vector.shape_cast %63 : vector<1x1x4x1xf32> to vector<4x1xf32>
    %65 = vector.shape_cast %62 : vector<4x1xf32> to vector<1x1x4x1xf32>
    tpu.vector_store %arg9[%c0_31, %c0_32, %c0_33, %c0_34], %65 {strides = array<i32>} : memref<1x1x4x1xf32, #tpu.memory_space<vmem>>, vector<1x1x4x1xf32>,
    return
  }
  func.func @transform_0(%arg0: i32, %arg1: i32) -> (i32, i32, i32) {
    %c0_i32 = arith.constant 0 : i32
    %c0_i32_0 = arith.constant 0 : i32
    %c0_i32_1 = arith.constant 0 : i32
    return %arg0, %c0_i32, %c0_i32_0 : i32, i32, i32
  }
  func.func @transform_1(%arg0: i32, %arg1: i32) -> (i32, i32) {
    %c0_i32 = arith.constant 0 : i32
    %c0_i32_0 = arith.constant 0 : i32
    %c0_i32_1 = arith.constant 0 : i32
    return %c0_i32, %c0_i32_0 : i32, i32
  }
  func.func @transform_2(%arg0: i32, %arg1: i32) -> (i32, i32) {
    %c0_i32 = arith.constant 0 : i32
    %c0_i32_0 = arith.constant 0 : i32
    %c0_i32_1 = arith.constant 0 : i32
    return %c0_i32, %c0_i32_0 : i32, i32
  }
  func.func @transform_3(%arg0: i32, %arg1: i32) -> (i32, i32) {
    %c0_i32 = arith.constant 0 : i32
    %c0_i32_0 = arith.constant 0 : i32
    %c0_i32_1 = arith.constant 0 : i32
    return %c0_i32, %c0_i32_0 : i32, i32
  }
  func.func @transform_4(%arg0: i32, %arg1: i32) -> (i32, i32) {
    %c0_i32 = arith.constant 0 : i32
    %c0_i32_0 = arith.constant 0 : i32
    %c0_i32_1 = arith.constant 0 : i32
    return %c0_i32, %c0_i32_0 : i32, i32
  }
  func.func @transform_5(%arg0: i32, %arg1: i32) -> (i32, i32, i32) {
    %c0_i32 = arith.constant 0 : i32
    %c0_i32_0 = arith.constant 0 : i32
    return %arg0, %c0_i32, %arg1 : i32, i32, i32
  }
  func.func @transform_6(%arg0: i32, %arg1: i32) -> (i32, i32, i32, i32) {
    %c0_i32 = arith.constant 0 : i32
    %c0_i32_0 = arith.constant 0 : i32
    %c0_i32_1 = arith.constant 0 : i32
    return %arg0, %arg1, %c0_i32, %c0_i32_0 : i32, i32, i32, i32
  }
  func.func @transform_7(%arg0: i32, %arg1: i32) -> (i32, i32, i32, i32) {
    %c0_i32 = arith.constant 0 : i32
    %c0_i32_0 = arith.constant 0 : i32
    %c0_i32_1 = arith.constant 0 : i32
    return %arg0, %arg1, %c0_i32, %c0_i32_0 : i32, i32, i32, i32
  }
}

</mosaic_0001>

<bundles_post_ra>
// kernel: tpu_custom_call.1
= control target key start
LH: loop header
LB: loop body
LE: loop exit
PB: predicated region body
PF: predicated region fallthrough
CT: control target
= control target key end

     0   :  { %13 = vsyncpa [#allocation3], 0  ;;  %s4371_s0 = inlined_call_operand.vmem [shape: f32[2,4,256], index: 0, kind: input, shape index: {}]   ;;  %s4372_s1 = inlined_call_operand.vmem [shape: f32[16,4], index: 1, kind: input, shape index: {}]   ;;  %s4373_s2 = inlined_call_operand.vmem [shape: f32[16,4], index: 2, kind: input, shape index: {}]   ;;  %s4374_s3 = inlined_call_operand.vmem [shape: f32[16,4], index: 3, kind: input, shape index: {}]   ;;  %s4375_s4 = inlined_call_operand.vmem [shape: f32[4,16], index: 4, kind: input, shape index: {}]   ;;  %s4376_s5 = inlined_call_operand.hbm [shape: f32[2,4,256], index: 5, kind: output, shape index: {0}]   ;;  %s4377_s6 = inlined_call_operand.vmem [shape: f32[2,1,4,1], index: 6, kind: output, shape index: {1}]   ;;  %s4378_s7 = inlined_call_operand.vmem [shape: f32[2,1,4,1], index: 7, kind: output, shape index: {2}]  }
   0x1   :  { %15 = vsyncpa [#allocation3 + $0x1], 0  ;;  %s2852_s24 = smov 0   ;;  %s2854_s25 = smov 0  }
   0x2   :  { %s2856_s26 = smov 0   ;;  %s2858_s27 = smov 0  }
   0x3   :  { %s2860_s28 = smov 0   ;;  %s2862_s29 = smov 0  }
   0x4 LB: > { %s2338_s30 = sadd.s32 4294967295, %s2806_s29   ;;  %s2339_s8 = sadd.s32 4294967294, %s2806_s29   ;;  %s2806_s29 = sphi %s2862_s29, %s21_s29   ;;  %s2802_s28 = sphi %s2860_s28, %s4682_s28   ;;  %s2798_s27 = sphi %s2858_s27, %s4681_s27   ;;  %s2794_s26 = sphi %s2856_s26, %s4680_s26   ;;  %s2790_s25 = sphi %s2854_s25, %s4679_s25   ;;  %s2786_s24 = sphi %s2852_s24, %s4678_s24  }
   0x5   : > { %s33_s9 = sadd.s32 1, %s2802_s28  ;;  %s152_s10 = sadd.s32 1, %s2794_s26 }
   0x6   : > { %p35_p0 = scmp.ge.s32.totalorder %s33_s9, 2  ;;  %p162_p1 = scmp.ne.s32.totalorder %s2794_s26, %s2790_s25 }
   0x7   : > { %p163_p2 = scmp.eq.s32.totalorder %s2338_s30, 1  ;;  %p168_p3 = scmp.ne.s32.totalorder %s2790_s25, %s2786_s24 }
   0x8   : > { %s4684_s9 = smov (%p35_p0, %s33_s9), 0  ;;  %p169_p5 = scmp.eq.s32.totalorder %s2339_s8, 1 }
   0x9   : > { %p2892_p4 = por %p163_p2, %p162_p1  ;;  %s147_s12 = ssub.s32 %s2802_s28, %s4684_s9 }
   0xa   : > { %p2342_p6 = scmp.ge.s32.totalorder %s2806_s29, 1  ;;  %p150_p7 = scmp.eq.s32.totalorder %s147_s12, 0 }
   0xb   : > { %p2899_p8 = por %p169_p5, %p168_p3  ;;  %p263_p9 = scmp.lt.s32.totalorder %s2806_s29, 3 }
   0xc   : > { %s2905_s14 = scalar_select %p150_p7, %s2794_s26, %s152_s10  }
   0xd   : > { %p264_p10 = pnand %p2342_p6, %p263_p9 }
   0xf   : > { %267 = sbr.rel (%p264_p10) target bundleno = 1894 (0x766), region = 40 }
  0x16   : > { %p309_p11 = scmp.lt.s32.totalorder %s2798_s27, 1  ;;  %v4379_v0 = vmov 0.0   ;;  %vm347_vm0 = vcmask 1043456   ;;  %v331_v3 = vld [vmem:[%s4372_s1] sm:$0xff]  ;;  %vm340_vm1 = vcmask 31744   ;;  %v332_v4 = vld [vmem:[%s4372_s1 + $0x8] sm:$0xff] }
  0x17   : > { %416 = vmatprep.mubr.f32.mxu1 %v4379_v0  ;;  %v333_v5 = vld [vmem:[%s4373_s2] sm:$0xff]  ;;  %v334_v6 = vld [vmem:[%s4373_s2 + $0x8] sm:$0xff]  ;;  %v4381_v9 = vmov 0   ;;  %vm633_vm2 = vcmask 64512   ;;  %s2810_s22 = smov 120   ;;  %s288_s23 = sand.u32 1, %s2790_s25  }
  0x18   : > { %s2910_s15 = scalar_select %p309_p11, %s2798_s27, 1  ;;  %v335_v7 = vld [vmem:[%s4374_s3] sm:$0xff]  ;;  %v336_v8 = vld [vmem:[%s4374_s3 + $0x8] sm:$0xff] }
  0x19   : > { %s2343_s30 = sshll.u32 %s288_s23, 3  ;;  %s2402_s10 = sshll.u32 %s2798_s27, 7 }
  0x1a   : > { %s2401_s16 = sshll.u32 %s2910_s15, 3  ;;  %s290_s8 = scalar_lea.vmem [#allocation2], %s2343_s30 }
  0x1b   : > { %s313_s19 = scalar_lea.vmem %s4371_s0, %s2401_s16  ;;  %s4323_s17 = scalar_lea.hbm %s4376_s5, %s2402_s10 }
  0x1c   : > { %v330_v1 = vld [vmem:[%s313_s19] sm:$0xff]  ;;  %s2200_s18 = sshll.u32 %s290_s8, 4  ;;  %s2170_s19 = scalar_lea.sflag [#allocation3], %s288_s23  ;;  %s2201_s18 = int_to_ptr.vmem [resolvable:$true] %s2200_s18 }
  0x1d   : > { %v339_v2 = vcombine.high %v330_v1, %v330_v1  ;;  %s2728_s20 = scalar_lea.vmem %s2201_s18, 128  ;;  %s2811_s21 = smov [#allocation2]  }
  0x1e   : > { %p2729_p12 = scmp.ne.s32.totalorder %s2201_s18, %s2728_s20 }
  0x1f   : > { %2348 = vmatprep.subr.msk.mxu1 %vm347_vm0, %v339_v2 }
  0x20   : > { %2349 = vmatpush1.msk.msra.mxu1 %vm347_vm0, %v330_v1  ;;  %p2730_p13 = pnand %p2729_p12, %p2892_p4 }
  0x21   : > { %2350 = vmatmul.mubr.msk.f32.vlgmr.msra.gmra.mrb[0].mxu1 %vm340_vm1, %v331_v3  ;;  %2352 = vmatprep.subr.msk.mxu1 %vm347_vm0, %v339_v2 }
  0x22   : > { %422 = vmatprep.mubr.f32.mxu1 %v4379_v0  ;;  %2353 = vmatpush1.msk.msra.mxu1 %vm347_vm0, %v330_v1  ;;  %p2731_p0 = pneg %p2730_p13 }
  0x23   : > { %2356 = vmatprep.subr.msk.mxu1 %vm347_vm0, %v339_v2 }
  0x25   : > { %2351 = vmatmul.mubr.msk.f32.gmra.mrb[2].mxu1 %vm340_vm1, %v332_v4 }
  0x26   : > { %499 = vmatprep.mubr.f32.mxu1 %v4379_v0 }
  0x29   : > { %2354 = vmatmul.mubr.msk.f32.vlgmr.msra.gmra.mrb[4].mxu1 %vm340_vm1, %v333_v5 }
  0x2a   : > { %505 = vmatprep.mubr.f32.mxu1 %v4379_v0  ;;  %2357 = vmatpush1.msk.msra.mxu1 %vm347_vm0, %v330_v1 }
  0x2d   : > { %2355 = vmatmul.mubr.msk.f32.gmra.mrb[6].mxu1 %vm340_vm1, %v334_v6 }
  0x2e   : > { %582 = vmatprep.mubr.f32.mxu1 %v4379_v0 }
  0x31   : > { %2358 = vmatmul.mubr.msk.f32.vlgmr.msra.gmra.mrb[8].mxu1 %vm340_vm1, %v335_v7 }
  0x32   : > { %588 = vmatprep.mubr.f32.mxu1 %v4379_v0 }
  0x35   : > { %2359 = vmatmul.mubr.msk.f32.gmra.mrb[10].mxu1 %vm340_vm1, %v336_v8 }
  0x36   : > { %720 = vmatprep.mubr.bf16.mxu1 %v4381_v9 }
  0xf4   : > { %v418_v10 = vpop.f32.mrb[0].mxu1 }
  0xf5   : > { %v595_v11 = vpack.c.bf16 %v418_v10, %v418_v10  ;;  %v420_v12 = vpop.f32.mrb[1].mxu1 }
  0xf6   : > { %v596_v13 = vpack.c.bf16 %v420_v12, %v420_v12 }
  0xf7   : > { %v683_v14 = vsel %vm347_vm0, %v595_v11, 0 }
  0xf8   : > { %v2953_v15 = vpop.f32.mrb[2].mxu1  ;;  %2360 = vmatprep.subr.msk.bf16.mxu1 %vm347_vm0, %v596_v13 }
  0xf9   : > { %4464 = vst [vmem:[#allocation5_spill] sm:$0xff] %v2953_v15  ;;  %v2956_v16 = vpop.f32.mrb[3].mxu1  ;;  %689 = vmatpush1.bf16.msra.mxu1 %v683_v14 }
  0xfa   : > { %4465 = vst [vmem:[#allocation6_spill] sm:$0xff] %v2956_v16 }
  0xfc   : > { %v501_v17 = vpop.f32.mrb[4].mxu1 }
  0xfd   : > { %v503_v18 = vpop.f32.mrb[5].mxu1  ;;  %v597_v19 = vpack.c.bf16 %v501_v17, %v501_v17 }
  0xfe   : > { %v598_v20 = vpack.c.bf16 %v503_v18, %v503_v18 }
  0xff   : > { %601 = vxpose.xlu0.c.b16.start.end [1/1] (short) %v597_v19, 128 }
 0x100   : > { %v507_v21 = vpop.f32.mrb[6].mxu1 }
 0x101   : > { %v1300_v22 = vpack.c.bf16 %v507_v21, %v507_v21  ;;  %v509_v23 = vpop.f32.mrb[7].mxu1 }
 0x102   : > { %v1301_v32 = vpack.c.bf16 %v509_v23, %v509_v23 }
 0x103   : > { %1304 = vxpose.xlu1.c.b16.start.end [1/1] (short) %v1300_v22, 128 }
 0x104   : > { %v2958_v24 = vpop.f32.mrb[8].mxu1 }
 0x105   : > { %4466 = vst [vmem:[#allocation7_spill] sm:$0xff] %v2958_v24  ;;  %v586_v25 = vpop.f32.mrb[9].mxu1 }
 0x106   : > { %v600_v26 = vpack.c.bf16 %v586_v25, %v586_v25 }
 0x108   : > { %1287 = vmatprep.mubr.bf16.mxu0 %v600_v26  ;;  %v2964_v29 = vpop.f32.mrb[10].mxu1 }
 0x109   : > { %4467 = vst [vmem:[#allocation8_spill] sm:$0xff] %v2964_v29  ;;  %v592_v30 = vpop.f32.mrb[11].mxu1 }
 0x10a   : > { %v1303_v46 = vpack.c.bf16 %v592_v30, %v592_v30 }
 0x11c   : > { %617 = vxpose.xlu0.c.b16.start.end [1/1] (short) %v598_v20, 128 }
 0x120   : > { %1320 = vxpose.xlu1.c.b16.start.end [1/1] (short) %v1301_v32, 128 }
 0x165   : > { %v609_v27 = vpop.trf.xlu0 }
 0x166   : > { %2361 = vmatmul.mubr.msk.bf16.vlgmr.msra.gmra.mrb[12].mxu1 %vm633_vm2, %v609_v27 }
 0x167   : > { %730 = vmatprep.mubr.bf16.mxu1 %v4381_v9 }
 0x169   : > { %v610_v28 = vpop.trf.xlu0 }
 0x16d   : > { %v611_v31 = vpop.trf.xlu0 }
 0x16e   : > { %2362 = vmatmul.mubr.msk.bf16.gmra.mrb[16].mxu1 %vm633_vm2, %v610_v28 }
 0x16f   : > { %740 = vmatprep.mubr.bf16.mxu1 %v4381_v9 }
 0x171   : > { %v612_v33 = vpop.trf.xlu0 }
 0x175   : > { %v613_v34 = vpop.trf.xlu0 }
 0x176   : > { %2363 = vmatmul.mubr.msk.bf16.gmra.mrb[20].mxu1 %vm633_vm2, %v611_v31 }
 0x177   : > { %750 = vmatprep.mubr.bf16.mxu1 %v4381_v9 }
 0x179   : > { %v614_v35 = vpop.trf.xlu0 }
 0x17d   : > { %v615_v36 = vpop.trf.xlu0 }
 0x17e   : > { %2364 = vmatmul.mubr.msk.bf16.gmra.mrb[24].mxu1 %vm633_vm2, %v612_v33 }
 0x17f   : > { %760 = vmatprep.mubr.bf16.mxu1 %v4381_v9 }
 0x181   : > { %v616_v37 = vpop.trf.xlu0 }
 0x185   : > { %v625_v38 = vpop.trf.xlu0 }
 0x186   : > { %2365 = vmatmul.mubr.msk.bf16.gmra.mrb[28].mxu1 %vm633_vm2, %v613_v34 }
 0x187   : > { %770 = vmatprep.mubr.bf16.mxu1 %v4381_v9 }
 0x189   : > { %v626_v39 = vpop.trf.xlu0 }
 0x18d   : > { %v627_v40 = vpop.trf.xlu0 }
 0x18e   : > { %2366 = vmatmul.mubr.msk.bf16.gmra.mrb[32].mxu1 %vm633_vm2, %v614_v35 }
 0x18f   : > { %780 = vmatprep.mubr.bf16.mxu1 %v4381_v9 }
 0x191   : > { %v628_v41 = vpop.trf.xlu0 }
 0x195   : > { %v629_v42 = vpop.trf.xlu0 }
 0x196   : > { %2367 = vmatmul.mubr.msk.bf16.gmra.mrb[36].mxu1 %vm633_vm2, %v615_v36 }
 0x197   : > { %790 = vmatprep.mubr.bf16.mxu1 %v4381_v9 }
 0x199   : > { %v630_v43 = vpop.trf.xlu0 }
 0x19d   : > { %v631_v44 = vpop.trf.xlu0 }
 0x19e   : > { %2368 = vmatmul.mubr.msk.bf16.gmra.mrb[40].mxu1 %vm633_vm2, %v616_v37 }
 0x19f   : > { %800 = vmatprep.mubr.bf16.mxu1 %v4381_v9 }
 0x1a1   : > { %v632_v45 = vpop.trf.xlu0 }
 0x1a6   : > { %2369 = vmatmul.mubr.msk.bf16.gmra.mrb[44].mxu1 %vm633_vm2, %v625_v38 }
 0x1a7   : > { %810 = vmatprep.mubr.bf16.mxu1 %v4381_v9 }
 0x1ae   : > { %2370 = vmatmul.mubr.msk.bf16.gmra.mrb[48].mxu1 %vm633_vm2, %v626_v39 }
 0x1af   : > { %820 = vmatprep.mubr.bf16.mxu1 %v4381_v9 }
 0x1b6   : > { %2371 = vmatmul.mubr.msk.bf16.gmra.mrb[52].mxu1 %vm633_vm2, %v627_v40 }
 0x1b7   : > { %830 = vmatprep.mubr.bf16.mxu1 %v4381_v9 }
 0x1be   : > { %2372 = vmatmul.mubr.msk.bf16.gmra.mrb[56].mxu1 %vm633_vm2, %v628_v41 }
 0x1bf   : > { %840 = vmatprep.mubr.bf16.mxu1 %v4381_v9 }
 0x1c6   : > { %2373 = vmatmul.mubr.msk.bf16.gmra.mrb[60].mxu1 %vm633_vm2, %v629_v42 }
 0x1c7   : > { %850 = vmatprep.mubr.bf16.mxu1 %v4381_v9 }
 0x1ce   : > { %2374 = vmatmul.mubr.msk.bf16.gmra.mrb[64].mxu1 %vm633_vm2, %v630_v43 }
 0x1cf   : > { %860 = vmatprep.mubr.bf16.mxu1 %v4381_v9 }
 0x1d6   : > { %2375 = vmatmul.mubr.msk.bf16.gmra.mrb[68].mxu1 %vm633_vm2, %v631_v44 }
 0x1d7   : > { %870 = vmatprep.mubr.bf16.mxu1 %v4381_v9 }
 0x1de   : > { %2376 = vmatmul.mubr.msk.bf16.gmra.mrb[72].mxu1 %vm633_vm2, %v632_v45 }
 0x1df   : > { %1989 = vmatprep.mubr.bf16.mxu1 %v1303_v46 }
 0x239   : > { %v2993_v47 = vpop.f32.mrb[12].mxu1 }
 0x23a   : > { %v2995_v48 = vpop.f32.mrb[13].mxu1 }
 0x23b   : > { %v2997_v49 = vpop.f32.mrb[14].mxu1 }
 0x23c   : > { %v2999_v50 = vpop.f32.mrb[15].mxu1 }
 0x241   : > { %v3001_v51 = vpop.f32.mrb[16].mxu1 }
 0x242   : > { %v881_v52 = vmax.f32 %v2993_v47, %v3001_v51  ;;  %v3005_v53 = vpop.f32.mrb[17].mxu1 }
 0x243   : > { %v918_v54 = vmax.f32 %v2995_v48, %v3005_v53  ;;  %v3009_v55 = vpop.f32.mrb[18].mxu1 }
 0x244   : > { %v882_v56 = vmax.f32 %v2997_v49, %v3009_v55  ;;  %v3013_v57 = vpop.f32.mrb[19].mxu1 }
 0x245   : > { %v919_v58 = vmax.f32 %v2999_v50, %v3013_v57 }
 0x249   : > { %v3017_v59 = vpop.f32.mrb[20].mxu1 }
 0x24a   : > { %v883_v60 = vmax.f32 %v881_v52, %v3017_v59  ;;  %v3020_v61 = vpop.f32.mrb[21].mxu1 }
 0x24b   : > { %v920_v62 = vmax.f32 %v918_v54, %v3020_v61  ;;  %v3023_v63 = vpop.f32.mrb[22].mxu1 }
 0x24c   : > { %v884_v1 = vmax.f32 %v882_v56, %v3023_v63  ;;  %v3026_v2 = vpop.f32.mrb[23].mxu1 }
 0x24d   : > { %v921_v3 = vmax.f32 %v919_v58, %v3026_v2 }
 0x251   : > { %v3029_v4 = vpop.f32.mrb[24].mxu1 }
 0x252   : > { %v885_v5 = vmax.f32 %v883_v60, %v3029_v4  ;;  %v3032_v6 = vpop.f32.mrb[25].mxu1 }
 0x253   : > { %v922_v7 = vmax.f32 %v920_v62, %v3032_v6  ;;  %v3035_v8 = vpop.f32.mrb[26].mxu1 }
 0x254   : > { %v886_v10 = vmax.f32 %v884_v1, %v3035_v8  ;;  %v3038_v11 = vpop.f32.mrb[27].mxu1 }
 0x255   : > { %v923_v12 = vmax.f32 %v921_v3, %v3038_v11 }
 0x259   : > { %v3041_v13 = vpop.f32.mrb[28].mxu1 }
 0x25a   : > { %v887_v14 = vmax.f32 %v885_v5, %v3041_v13  ;;  %v3044_v17 = vpop.f32.mrb[29].mxu1 }
 0x25b   : > { %v924_v18 = vmax.f32 %v922_v7, %v3044_v17  ;;  %v3047_v19 = vpop.f32.mrb[30].mxu1 }
 0x25c   : > { %v888_v20 = vmax.f32 %v886_v10, %v3047_v19  ;;  %v3050_v21 = vpop.f32.mrb[31].mxu1 }
 0x25d   : > { %v925_v22 = vmax.f32 %v923_v12, %v3050_v21 }
 0x261   : > { %v3053_v23 = vpop.f32.mrb[32].mxu1 }
 0x262   : > { %v889_v25 = vmax.f32 %v887_v14, %v3053_v23  ;;  %v3056_v26 = vpop.f32.mrb[33].mxu1 }
 0x263   : > { %v926_v27 = vmax.f32 %v924_v18, %v3056_v26  ;;  %v3059_v28 = vpop.f32.mrb[34].mxu1 }
 0x264   : > { %v890_v30 = vmax.f32 %v888_v20, %v3059_v28  ;;  %v3062_v31 = vpop.f32.mrb[35].mxu1 }
 0x265   : > { %4468 = vst [vmem:[#allocation9_spill] sm:$0xff] %v3062_v31  ;;  %v927_v32 = vmax.f32 %v925_v22, %v3062_v31 }
 0x269   : > { %v3065_v33 = vpop.f32.mrb[36].mxu1 }
 0x26a   : > { %v891_v34 = vmax.f32 %v889_v25, %v3065_v33  ;;  %v3068_v35 = vpop.f32.mrb[37].mxu1 }
 0x26b   : > { %4469 = vst [vmem:[#allocation10_spill] sm:$0xff] %v3068_v35  ;;  %v928_v36 = vmax.f32 %v926_v27, %v3068_v35  ;;  %v3071_v37 = vpop.f32.mrb[38].mxu1 }
 0x26c   : > { %v892_v38 = vmax.f32 %v890_v30, %v3071_v37  ;;  %v3074_v39 = vpop.f32.mrb[39].mxu1 }
 0x26d   : > { %4470 = vst [vmem:[#allocation11_spill] sm:$0xff] %v3074_v39  ;;  %v929_v40 = vmax.f32 %v927_v32, %v3074_v39 }
 0x271   : > { %v3077_v41 = vpop.f32.mrb[40].mxu1 }
 0x272   : > { %v893_v42 = vmax.f32 %v891_v34, %v3077_v41  ;;  %v3080_v43 = vpop.f32.mrb[41].mxu1 }
 0x273   : > { %4471 = vst [vmem:[#allocation12_spill] sm:$0xff] %v3080_v43  ;;  %v930_v44 = vmax.f32 %v928_v36, %v3080_v43  ;;  %v3083_v45 = vpop.f32.mrb[42].mxu1 }
 0x274   : > { %v894_v46 = vmax.f32 %v892_v38, %v3083_v45  ;;  %v3086_v52 = vpop.f32.mrb[43].mxu1 }
 0x275   : > { %4472 = vst [vmem:[#allocation13_spill] sm:$0xff] %v3086_v52  ;;  %v931_v54 = vmax.f32 %v929_v40, %v3086_v52 }
 0x279   : > { %v3089_v56 = vpop.f32.mrb[44].mxu1 }
 0x27a   : > { %v895_v58 = vmax.f32 %v893_v42, %v3089_v56  ;;  %v3092_v60 = vpop.f32.mrb[45].mxu1 }
 0x27b   : > { %4473 = vst [vmem:[#allocation14_spill] sm:$0xff] %v3092_v60  ;;  %v932_v62 = vmax.f32 %v930_v44, %v3092_v60  ;;  %v3095_v1 = vpop.f32.mrb[46].mxu1 }
 0x27c   : > { %v896_v3 = vmax.f32 %v894_v46, %v3095_v1  ;;  %v3098_v5 = vpop.f32.mrb[47].mxu1 }
 0x27d   : > { %4474 = vst [vmem:[#allocation15_spill] sm:$0xff] %v3098_v5  ;;  %v933_v7 = vmax.f32 %v931_v54, %v3098_v5 }
 0x281   : > { %v3101_v10 = vpop.f32.mrb[48].mxu1 }
 0x282   : > { %v897_v12 = vmax.f32 %v895_v58, %v3101_v10  ;;  %v3104_v14 = vpop.f32.mrb[49].mxu1 }
 0x283   : > { %4475 = vst [vmem:[#allocation16_spill] sm:$0xff] %v3104_v14  ;;  %v934_v18 = vmax.f32 %v932_v62, %v3104_v14  ;;  %v3107_v20 = vpop.f32.mrb[50].mxu1 }
 0x284   : > { %v898_v22 = vmax.f32 %v896_v3, %v3107_v20  ;;  %v3110_v25 = vpop.f32.mrb[51].mxu1 }
 0x285   : > { %4476 = vst [vmem:[#allocation17_spill] sm:$0xff] %v3110_v25  ;;  %v935_v27 = vmax.f32 %v933_v7, %v3110_v25 }
 0x289   : > { %v3113_v30 = vpop.f32.mrb[52].mxu1 }
 0x28a   : > { %v899_v32 = vmax.f32 %v897_v12, %v3113_v30  ;;  %v3116_v34 = vpop.f32.mrb[53].mxu1 }
 0x28b   : > { %4477 = vst [vmem:[#allocation18_spill] sm:$0xff] %v3116_v34  ;;  %v936_v36 = vmax.f32 %v934_v18, %v3116_v34  ;;  %v3119_v38 = vpop.f32.mrb[54].mxu1 }
 0x28c   : > { %v900_v40 = vmax.f32 %v898_v22, %v3119_v38  ;;  %v3122_v42 = vpop.f32.mrb[55].mxu1 }
 0x28d   : > { %4478 = vst [vmem:[#allocation19_spill] sm:$0xff] %v3122_v42  ;;  %v937_v44 = vmax.f32 %v935_v27, %v3122_v42 }
 0x291   : > { %v3125_v46 = vpop.f32.mrb[56].mxu1 }
 0x292   : > { %v901_v54 = vmax.f32 %v899_v32, %v3125_v46  ;;  %v3128_v58 = vpop.f32.mrb[57].mxu1 }
 0x293   : > { %4479 = vst [vmem:[#allocation20_spill] sm:$0xff] %v3128_v58  ;;  %v938_v62 = vmax.f32 %v936_v36, %v3128_v58  ;;  %v3131_v3 = vpop.f32.mrb[58].mxu1 }
 0x294   : > { %v902_v7 = vmax.f32 %v900_v40, %v3131_v3  ;;  %v3134_v12 = vpop.f32.mrb[59].mxu1 }
 0x295   : > { %4480 = vst [vmem:[#allocation21_spill] sm:$0xff] %v3134_v12  ;;  %v939_v18 = vmax.f32 %v937_v44, %v3134_v12 }
 0x299   : > { %v3137_v22 = vpop.f32.mrb[60].mxu1 }
 0x29a   : > { %v903_v27 = vmax.f32 %v901_v54, %v3137_v22  ;;  %v3140_v0 = vpop.f32.mrb[61].mxu1 }
 0x29b   : > { %4481 = vst [vmem:[#allocation22_spill] sm:$0xff] %v3140_v0  ;;  %v940_v32 = vmax.f32 %v938_v62, %v3140_v0  ;;  %v3143_v9 = vpop.f32.mrb[62].mxu1 }
 0x29c   : > { %v904_v36 = vmax.f32 %v902_v7, %v3143_v9  ;;  %v3146_v29 = vpop.f32.mrb[63].mxu1 }
 0x29d   : > { %4482 = vst [vmem:[#allocation23_spill] sm:$0xff] %v3146_v29  ;;  %v941_v40 = vmax.f32 %v939_v18, %v3146_v29 }
 0x2a1   : > { %v3149_v24 = vpop.f32.mrb[64].mxu1 }
 0x2a2   : > { %v905_v44 = vmax.f32 %v903_v27, %v3149_v24  ;;  %v3152_v16 = vpop.f32.mrb[65].mxu1 }
 0x2a3   : > { %4483 = vst [vmem:[#allocation24_spill] sm:$0xff] %v3152_v16  ;;  %v942_v54 = vmax.f32 %v940_v32, %v3152_v16  ;;  %v3155_v15 = vpop.f32.mrb[66].mxu1 }
 0x2a4   : > { %v906_v62 = vmax.f32 %v904_v36, %v3155_v15  ;;  %v3158_v0 = vpop.f32.mrb[67].mxu1 }
 0x2a5   : > { %4484 = vst [vmem:[#allocation25_spill] sm:$0xff] %v3158_v0  ;;  %v943_v7 = vmax.f32 %v941_v40, %v3158_v0 }
 0x2a9   : > { %v3161_v12 = vpop.f32.mrb[68].mxu1 }
 0x2aa   : > { %v907_v18 = vmax.f32 %v905_v44, %v3161_v12  ;;  %v3164_v29 = vpop.f32.mrb[69].mxu1 }
 0x2ab   : > { %4485 = vst [vmem:[#allocation26_spill] sm:$0xff] %v3164_v29  ;;  %v944_v27 = vmax.f32 %v942_v54, %v3164_v29  ;;  %v3167_v58 = vpop.f32.mrb[70].mxu1 }
 0x2ac   : > { %v908_v32 = vmax.f32 %v906_v62, %v3167_v58  ;;  %v3170_v16 = vpop.f32.mrb[71].mxu1 }
 0x2ad   : > { %4486 = vst [vmem:[#allocation27_spill] sm:$0xff] %v3170_v16  ;;  %v945_v36 = vmax.f32 %v943_v7, %v3170_v16 }
 0x2b1   : > { %v3173_v42 = vpop.f32.mrb[72].mxu1 }
 0x2b2   : > { %v909_v40 = vmax.f32 %v907_v18, %v3173_v42  ;;  %v3176_v0 = vpop.f32.mrb[73].mxu1 }
 0x2b3   : > { %4487 = vst [vmem:[#allocation28_spill] sm:$0xff] %v3176_v0  ;;  %v946_v44 = vmax.f32 %v944_v27, %v3176_v0  ;;  %v3179_v34 = vpop.f32.mrb[74].mxu1 }
 0x2b4   : > { %v910_v54 = vmax.f32 %v908_v32, %v3179_v34  ;;  %v3182_v29 = vpop.f32.mrb[75].mxu1 }
 0x2b5   : > { %4488 = vst [vmem:[#allocation29_spill] sm:$0xff] %v3182_v29  ;;  %v947_v62 = vmax.f32 %v945_v36, %v3182_v29 }
 0x2b6   : > { %v911_v25 = vmax.f32 %v909_v40, %v910_v54 }
 0x2b7   : > { %v948_v14 = vmax.f32 %v946_v44, %v947_v62 }
 0x2b8   : > { %v912_v5 = vrot.slane %v911_v25, 4 }
 0x2b9   : > { %v949_v7 = vrot.slane %v948_v14, 4 }
 0x2ba   : > { %v913_v16 = vmax.f32 %v911_v25, %v912_v5 }
 0x2bb   : > { %v950_v60 = vmax.f32 %v948_v14, %v949_v7 }
 0x2bc   : > { %v914_v52 = vrot.slane %v913_v16, 2 }
 0x2bd   : > { %v951_v18 = vrot.slane %v950_v60, 2 }
 0x2be   : > { %v915_v43 = vmax.f32 %v913_v16, %v914_v52  ;;  %v4508_v52 = vld [vmem:[#allocation28_spill] sm:$0xff] }
 0x2bf   : > { %v952_v39 = vmax.f32 %v950_v60, %v951_v18 }
 0x2c0   : > { %v916_v35 = vrot.slane %v915_v43, 1 }
 0x2c1   : > { %v953_v27 = vrot.slane %v952_v39, 1 }
 0x2c2   : > { %v3185_v0 = vmax.f32 %v915_v43, %v916_v35 }
 0x2c3   : > { %v3187_v31 = vmax.f32 %v952_v39, %v953_v27 }
 0x2c4   : > { %v955_v32 = vsub.f32 %v2993_v47, %v3185_v0  ;;  %v957_v36 = vsub.f32 %v2997_v49, %v3185_v0  ;;  %v959_v5 = vsub.f32 %v3001_v51, %v3185_v0  ;;  %v961_v14 = vsub.f32 %v3009_v55, %v3185_v0 }
 0x2c5   : > { %v963_v16 = vsub.f32 %v3017_v59, %v3185_v0  ;;  %v965_v35 = vsub.f32 %v3023_v63, %v3185_v0  ;;  %v967_v39 = vsub.f32 %v3029_v4, %v3185_v0  ;;  %v969_v47 = vsub.f32 %v3035_v8, %v3185_v0 }
 0x2c6   : > { %v971_v49 = vsub.f32 %v3041_v13, %v3185_v0  ;;  %v973_v51 = vsub.f32 %v3047_v19, %v3185_v0  ;;  %v975_v55 = vsub.f32 %v3053_v23, %v3185_v0  ;;  %v977_v59 = vsub.f32 %v3059_v28, %v3185_v0 }
 0x2c7   : > { %v979_v63 = vsub.f32 %v3065_v33, %v3185_v0  ;;  %v981_v4 = vsub.f32 %v3071_v37, %v3185_v0  ;;  %v983_v8 = vsub.f32 %v3077_v41, %v3185_v0  ;;  %v985_v13 = vsub.f32 %v3083_v45, %v3185_v0 }
 0x2c8   : > { %v987_v19 = vsub.f32 %v3089_v56, %v3185_v0  ;;  %v989_v23 = vsub.f32 %v3095_v1, %v3185_v0  ;;  %v991_v28 = vsub.f32 %v3101_v10, %v3185_v0  ;;  %v993_v33 = vsub.f32 %v3107_v20, %v3185_v0 }
 0x2c9   : > { %v995_v37 = vsub.f32 %v3113_v30, %v3185_v0  ;;  %v997_v41 = vsub.f32 %v3119_v38, %v3185_v0  ;;  %v999_v43 = vsub.f32 %v3125_v46, %v3185_v0  ;;  %v1001_v45 = vsub.f32 %v3131_v3, %v3185_v0 }
 0x2ca   : > { %v1019_v38 = vmul.f32 1.442695, %v955_v32  ;;  %v1023_v46 = vmul.f32 1.442695, %v957_v36  ;;  %v1027_v3 = vmul.f32 1.442695, %v959_v5 }
 0x2cb   : > { %v1031_v44 = vmul.f32 1.442695, %v961_v14  ;;  %v1035_v62 = vmul.f32 1.442695, %v963_v16  ;;  %v1039_v7 = vmul.f32 1.442695, %v965_v35 }
 0x2cc   : > { %2464 = vpow2.f32 %v1019_v38  ;;  %v1043_v18 = vmul.f32 1.442695, %v967_v39  ;;  %v1047_v27 = vmul.f32 1.442695, %v969_v47  ;;  %v1051_v25 = vmul.f32 1.442695, %v971_v49 }
 0x2cd   : > { %2466 = vpow2.f32 %v1023_v46  ;;  %v1055_v30 = vmul.f32 1.442695, %v973_v51  ;;  %v1059_v32 = vmul.f32 1.442695, %v975_v55  ;;  %v1063_v36 = vmul.f32 1.442695, %v977_v59 }
 0x2ce   : > { %2468 = vpow2.f32 %v1027_v3  ;;  %v1067_v5 = vmul.f32 1.442695, %v979_v63  ;;  %v1071_v40 = vmul.f32 1.442695, %v981_v4  ;;  %v1075_v14 = vmul.f32 1.442695, %v983_v8 }
 0x2cf   : > { %2470 = vpow2.f32 %v1031_v44  ;;  %v1079_v20 = vmul.f32 1.442695, %v985_v13  ;;  %v1083_v54 = vmul.f32 1.442695, %v987_v19  ;;  %v1087_v38 = vmul.f32 1.442695, %v989_v23 }
 0x2d0   : > { %2472 = vpow2.f32 %v1035_v62  ;;  %v1091_v16 = vmul.f32 1.442695, %v991_v28  ;;  %v1095_v35 = vmul.f32 1.442695, %v993_v33  ;;  %v1099_v46 = vmul.f32 1.442695, %v995_v37 }
 0x2d1   : > { %2474 = vpow2.f32 %v1039_v7  ;;  %v3257_v39 = vmul.f32 1.442695, %v997_v41  ;;  %v3259_v47 = vmul.f32 1.442695, %v999_v43  ;;  %v3261_v49 = vmul.f32 1.442695, %v1001_v45 }
 0x2d2   : > { %2476 = vpow2.f32 %v1043_v18  ;;  %v4489_v37 = vld [vmem:[#allocation9_spill] sm:$0xff]  ;;  %v4491_v3 = vld [vmem:[#allocation11_spill] sm:$0xff]  ;;  %v4492_v7 = vld [vmem:[#allocation12_spill] sm:$0xff] }
 0x2d3   : > { %2478 = vpow2.f32 %v1047_v27  ;;  %v4493_v27 = vld [vmem:[#allocation13_spill] sm:$0xff]  ;;  %v4495_v33 = vld [vmem:[#allocation15_spill] sm:$0xff]  ;;  %v4496_v28 = vld [vmem:[#allocation16_spill] sm:$0xff] }
 0x2d4   : > { %2480 = vpow2.f32 %v1051_v25  ;;  %v4490_v25 = vld [vmem:[#allocation10_spill] sm:$0xff]  ;;  %v4497_v18 = vld [vmem:[#allocation17_spill] sm:$0xff]  ;;  %v4499_v8 = vld [vmem:[#allocation19_spill] sm:$0xff] }
 0x2d5   : > { %2482 = vpow2.f32 %v1055_v30  ;;  %v4498_v13 = vld [vmem:[#allocation18_spill] sm:$0xff]  ;;  %v4500_v44 = vld [vmem:[#allocation20_spill] sm:$0xff]  ;;  %v4501_v59 = vld [vmem:[#allocation21_spill] sm:$0xff] }
 0x2d6   : > { %v3271_v4 = vpop.eup %2464  ;;  %2484 = vpow2.f32 %v1059_v32  ;;  %v4502_v32 = vld [vmem:[#allocation22_spill] sm:$0xff]  ;;  %v4503_v51 = vld [vmem:[#allocation23_spill] sm:$0xff] }
 0x2d7   : > { %v3279_v23 = vpop.eup %2466  ;;  %2486 = vpow2.f32 %v1063_v36  ;;  %v4494_v36 = vld [vmem:[#allocation14_spill] sm:$0xff] }
 0x2d8   : > { %v3287_v43 = vpop.eup %2468  ;;  %2488 = vpow2.f32 %v1067_v5  ;;  %v1147_v45 = vadd.f32 %v3279_v23, %v3271_v4  ;;  %v4507_v5 = vld [vmem:[#allocation27_spill] sm:$0xff] }
 0x2d9   : > { %v3295_v62 = vpop.eup %2470  ;;  %2490 = vpow2.f32 %v1071_v40  ;;  %v4505_v40 = vld [vmem:[#allocation25_spill] sm:$0xff] }
 0x2da   : > { %v3303_v41 = vpop.eup %2472  ;;  %2492 = vpow2.f32 %v1075_v14  ;;  %v1148_v30 = vadd.f32 %v3287_v43, %v1147_v45 }
 0x2db   : > { %v3310_v19 = vpop.eup %2474  ;;  %2494 = vpow2.f32 %v1079_v20 }
 0x2dc   : > { %v3318_v63 = vpop.eup %2476  ;;  %2496 = vpow2.f32 %v1083_v54  ;;  %v1149_v45 = vadd.f32 %v3295_v62, %v1148_v30 }
 0x2dd   : > { %v3325_v55 = vpop.eup %2478  ;;  %2498 = vpow2.f32 %v1087_v38 }
 0x2de   : > { %v3333_v1 = vpop.eup %2480  ;;  %2500 = vpow2.f32 %v1091_v16  ;;  %v1150_v30 = vadd.f32 %v3303_v41, %v1149_v45  ;;  %v4509_v45 = vsub.f32 %v3137_v22, %v3185_v0 }
 0x2df   : > { %v3340_v56 = vpop.eup %2482  ;;  %2502 = vpow2.f32 %v1095_v35  ;;  %v4510_v35 = vsub.f32 %v3143_v9, %v3185_v0 }
 0x2e0   : > { %v3348_v10 = vpop.eup %2484  ;;  %2504 = vpow2.f32 %v1099_v46  ;;  %v1115_v20 = vmul.f32 1.442695, %v4509_v45  ;;  %v1151_v38 = vadd.f32 %v3310_v19, %v1150_v30  ;;  %v4511_v46 = vsub.f32 %v3149_v24, %v3185_v0 }
 0x2e1   : > { %v3354_v60 = vpop.eup %2486  ;;  %2506 = vpow2.f32 %v3257_v39  ;;  %v1119_v54 = vmul.f32 1.442695, %v4510_v35  ;;  %v4512_v39 = vsub.f32 %v3155_v15, %v3185_v0  ;;  %v4516_v15 = vsub.f32 %v3173_v42, %v3185_v0 }
 0x2e2   : > { %v3360_v14 = vpop.eup %2488  ;;  %2508 = vpow2.f32 %v3259_v47  ;;  %v1123_v16 = vmul.f32 1.442695, %v4511_v46  ;;  %v1152_v22 = vadd.f32 %v3318_v63, %v1151_v38  ;;  %v4513_v47 = vsub.f32 %v3161_v12, %v3185_v0 }
 0x2e3   : > { %v3367_v45 = vpop.eup %2490  ;;  %2510 = vpow2.f32 %v3261_v49  ;;  %v1127_v30 = vmul.f32 1.442695, %v4512_v39  ;;  %v4514_v38 = vsub.f32 %v3167_v58, %v3185_v0 }
 0x2e4   : > { %v3373_v9 = vpop.eup %2492  ;;  %2512 = vpow2.f32 %v1115_v20  ;;  %v1131_v35 = vmul.f32 1.442695, %v4513_v47  ;;  %v1153_v24 = vadd.f32 %v3325_v55, %v1152_v22  ;;  %v1139_v20 = vmul.f32 1.442695, %v4516_v15 }
 0x2e5   : > { %v3379_v46 = vpop.eup %2494  ;;  %2514 = vpow2.f32 %v1119_v54  ;;  %v1135_v49 = vmul.f32 1.442695, %v4514_v38  ;;  %v4517_v22 = vsub.f32 %v3179_v34, %v3185_v0  ;;  %v4520_v0 = vsub.f32 %v3005_v53, %v3187_v31 }
 0x2e6   : > { %v3384_v29 = vpop.eup %2496  ;;  %2516 = vpow2.f32 %v1123_v16  ;;  %v1154_v39 = vadd.f32 %v3333_v1, %v1153_v24  ;;  %v4518_v16 = vsub.f32 %v2995_v48, %v3187_v31  ;;  %v4519_v24 = vsub.f32 %v2999_v50, %v3187_v31 }
 0x2e7   : > { %4515 = vst [vmem:[#allocation9_spill] sm:$0xff] %v3384_v29  ;;  %v3390_v12 = vpop.eup %2498  ;;  %2518 = vpow2.f32 %v1127_v30  ;;  %v1143_v54 = vmul.f32 1.442695, %v4517_v22  ;;  %v1029_v34 = vmul.f32 1.442695, %v4520_v0  ;;  %v4521_v48 = vsub.f32 %v3013_v57, %v3187_v31 }
 0x2e8   : > { %v3395_v47 = vpop.eup %2500  ;;  %2520 = vpow2.f32 %v1131_v35  ;;  %v1155_v58 = vadd.f32 %v3340_v56, %v1154_v39  ;;  %v1021_v38 = vmul.f32 1.442695, %v4518_v16  ;;  %v1025_v30 = vmul.f32 1.442695, %v4519_v24 }
 0x2e9   : > { %v3401_v42 = vpop.eup %2502  ;;  %2522 = vpow2.f32 %v1135_v49  ;;  %v1033_v39 = vmul.f32 1.442695, %v4521_v48  ;;  %v4522_v49 = vsub.f32 %v3020_v61, %v3187_v31  ;;  %v4523_v50 = vsub.f32 %v3026_v2, %v3187_v31 }
 0x2ea   : > { %v3409_v15 = vpop.eup %2504  ;;  %2524 = vpow2.f32 %v1139_v20  ;;  %v1156_v35 = vadd.f32 %v3348_v10, %v1155_v58  ;;  %v4524_v20 = vsub.f32 %v3032_v6, %v3187_v31  ;;  %v4525_v58 = vsub.f32 %v3038_v11, %v3187_v31 }
 0x2eb   : > { %v1037_v22 = vmul.f32 1.442695, %v4522_v49  ;;  %v3418_v16 = vpop.eup %2506  ;;  %2526 = vpow2.f32 %v1143_v54  ;;  %v1041_v53 = vmul.f32 1.442695, %v4523_v50  ;;  %v4526_v54 = vsub.f32 %v3044_v17, %v3187_v31 }
 0x2ec   : > { %v1045_v24 = vmul.f32 1.442695, %v4524_v20  ;;  %v1049_v57 = vmul.f32 1.442695, %v4525_v58  ;;  %v3429_v0 = vpop.eup %2508  ;;  %v1157_v61 = vadd.f32 %v3354_v60, %v1156_v35  ;;  %2528 = vpow2.f32 %v1021_v38 }
 0x2ed   : > { %v1053_v48 = vmul.f32 1.442695, %v4526_v54  ;;  %v4527_v2 = vsub.f32 %v3050_v21, %v3187_v31  ;;  %v3438_v50 = vpop.eup %2510  ;;  %2530 = vpow2.f32 %v1025_v30 }
 0x2ee   : > { %v3446_v35 = vpop.eup %2512  ;;  %v1158_v17 = vadd.f32 %v3360_v14, %v1157_v61  ;;  %2532 = vpow2.f32 %v1029_v34 }
 0x2ef   : > { %v1057_v49 = vmul.f32 1.442695, %v4527_v2  ;;  %v3453_v20 = vpop.eup %2514  ;;  %2534 = vpow2.f32 %v1033_v39  ;;  %v4528_v39 = vsub.f32 %v3056_v26, %v3187_v31  ;;  %v4529_v2 = vsub.f32 %v4489_v37, %v3187_v31 }
 0x2f0   : > { %v3461_v61 = vpop.eup %2516  ;;  %v1159_v34 = vadd.f32 %v3367_v45, %v1158_v17  ;;  %2536 = vpow2.f32 %v1037_v22 }
 0x2f1   : > { %v3468_v21 = vpop.eup %2518  ;;  %2538 = vpow2.f32 %v1041_v53  ;;  %v1061_v30 = vmul.f32 1.442695, %v4528_v39  ;;  %v1065_v54 = vmul.f32 1.442695, %v4529_v2 }
 0x2f2   : > { %v3476_v17 = vpop.eup %2520  ;;  %v1160_v22 = vadd.f32 %v3373_v9, %v1159_v34  ;;  %2540 = vpow2.f32 %v1045_v24  ;;  %v4530_v24 = vsub.f32 %v4490_v25, %v3187_v31  ;;  %v4535_v25 = vsub.f32 %v4495_v33, %v3187_v31 }
 0x2f3   : > { %v3484_v38 = vpop.eup %2522  ;;  %2542 = vpow2.f32 %v1049_v57  ;;  %v4531_v57 = vsub.f32 %v4491_v3, %v3187_v31  ;;  %v4534_v3 = vsub.f32 %v4494_v36, %v3187_v31  ;;  %v4538_v33 = vsub.f32 %v4498_v13, %v3187_v31 }
 0x2f4   : > { %v3489_v58 = vpop.eup %2524  ;;  %v1161_v11 = vadd.f32 %v3379_v46, %v1160_v22  ;;  %2544 = vpow2.f32 %v1053_v48  ;;  %v1069_v26 = vmul.f32 1.442695, %v4530_v24  ;;  %v4532_v48 = vsub.f32 %v4492_v7, %v3187_v31 }
 0x2f5   : > { %v3497_v39 = vpop.eup %2526  ;;  %2546 = vpow2.f32 %v1057_v49  ;;  %v1073_v37 = vmul.f32 1.442695, %v4531_v57  ;;  %v4533_v49 = vsub.f32 %v4493_v27, %v3187_v31  ;;  %v1085_v57 = vmul.f32 1.442695, %v4534_v3 }
 0x2f6   : > { %v2529_v2 = vpop.eup %2528  ;;  %v1162_v53 = vadd.f32 %v3384_v29, %v1161_v11  ;;  %2548 = vpow2.f32 %v1061_v30  ;;  %v1077_v22 = vmul.f32 1.442695, %v4532_v48  ;;  %v4536_v27 = vsub.f32 %v4496_v28, %v3187_v31 }
 0x2f7   : > { %v2531_v24 = vpop.eup %2530  ;;  %2550 = vpow2.f32 %v1065_v54  ;;  %v1081_v34 = vmul.f32 1.442695, %v4533_v49  ;;  %v1089_v54 = vmul.f32 1.442695, %v4535_v25  ;;  %v1101_v25 = vmul.f32 1.442695, %v4538_v33 }
 0x2f8   : > { %v2533_v6 = vpop.eup %2532  ;;  %v1163_v11 = vadd.f32 %v3390_v12, %v1162_v53  ;;  %2552 = vpow2.f32 %v1069_v26  ;;  %v1184_v30 = vadd.f32 %v2531_v24, %v2529_v2  ;;  %v1224_v7 = vpack.c.bf16 %v2531_v24, %v2529_v2 }
 0x2f9   : > { %v2535_v48 = vpop.eup %2534  ;;  %2554 = vpow2.f32 %v1073_v37  ;;  %v1093_v49 = vmul.f32 1.442695, %v4536_v27  ;;  %v4537_v37 = vsub.f32 %v4497_v18, %v3187_v31  ;;  %v4539_v28 = vpack.c.bf16 %v3279_v23, %v3271_v4 }
 0x2fa   : > { %v2537_v29 = vpop.eup %2536  ;;  %v1164_v36 = vadd.f32 %v3395_v47, %v1163_v11  ;;  %2556 = vpow2.f32 %v1077_v22  ;;  %v1185_v3 = vadd.f32 %v2533_v6, %v1184_v30  ;;  %1255 = vmatprep.subr.bf16.mxu0 %v1224_v7  ;;  %v1226_v53 = vpack.c.bf16 %v2535_v48, %v2533_v6 }
 0x2fb   : > { %v2539_v26 = vpop.eup %2538  ;;  %2558 = vpow2.f32 %v1081_v34  ;;  %v1097_v2 = vmul.f32 1.442695, %v4537_v37  ;;  %1256 = vmatpush1.bf16.msra.mxu0 %v4539_v28  ;;  %v4540_v18 = vsub.f32 %v4499_v8, %v3187_v31  ;;  %v4541_v13 = vsub.f32 %v4500_v44, %v3187_v31  ;;  %v4546_v28 = vld [vmem:[#allocation24_spill] sm:$0xff] }
 0x2fc   : > { %v2541_v24 = vpop.eup %2540  ;;  %v1165_v22 = vadd.f32 %v3401_v42, %v1164_v36  ;;  %2560 = vpow2.f32 %v1085_v57  ;;  %v1186_v11 = vadd.f32 %v2535_v48, %v1185_v3  ;;  %1257 = vmatprep.subr.bf16.mxu0 %v1226_v53  ;;  %v1228_v6 = vpack.c.bf16 %v2539_v26, %v2537_v29 }
 0x2fd   : > { %v2543_v34 = vpop.eup %2542  ;;  %2562 = vpow2.f32 %v1089_v54  ;;  %v1105_v30 = vmul.f32 1.442695, %v4540_v18  ;;  %v1109_v7 = vmul.f32 1.442695, %v4541_v13  ;;  %v4542_v48 = vsub.f32 %v4501_v59, %v3187_v31 }
 0x2fe   : > { %v2545_v27 = vpop.eup %2544  ;;  %v1166_v4 = vadd.f32 %v3409_v15, %v1165_v22  ;;  %2564 = vpow2.f32 %v1093_v49  ;;  %v1187_v23 = vadd.f32 %v2537_v29, %v1186_v11  ;;  %v1230_v36 = vpack.c.bf16 %v2543_v34, %v2541_v24 }
 0x2ff   : > { %v2547_v57 = vpop.eup %2546  ;;  %2566 = vpow2.f32 %v1097_v2  ;;  %v1113_v54 = vmul.f32 1.442695, %v4542_v48  ;;  %v4543_v8 = vsub.f32 %v4502_v32, %v3187_v31  ;;  %v4544_v44 = vpack.c.bf16 %v3295_v62, %v3287_v43 }
 0x300   : > { %v2549_v53 = vpop.eup %2548  ;;  %v1167_v37 = vadd.f32 %v3418_v16, %v1166_v4  ;;  %2568 = vpow2.f32 %v1101_v25  ;;  %v1188_v29 = vadd.f32 %v2539_v26, %v1187_v23  ;;  %v1232_v49 = vpack.c.bf16 %v2547_v57, %v2545_v27 }
 0x301   : > { %v1117_v3 = vmul.f32 1.442695, %v4543_v8  ;;  %1258 = vmatpush1.bf16.msra.mxu0 %v4544_v44  ;;  %v2551_v2 = vpop.eup %2550  ;;  %2570 = vpow2.f32 %v1105_v30  ;;  %v4545_v59 = vsub.f32 %v4503_v51, %v3187_v31  ;;  %v4547_v32 = vsub.f32 %v4546_v28, %v3187_v31  ;;  %v4549_v30 = vld [vmem:[#allocation26_spill] sm:$0xff] }
 0x302   : > { %1259 = vmatprep.subr.bf16.mxu0 %v1228_v6  ;;  %v2553_v11 = vpop.eup %2552  ;;  %v1168_v43 = vadd.f32 %v3429_v0, %v1167_v37  ;;  %2572 = vpow2.f32 %v1109_v7  ;;  %v1189_v62 = vadd.f32 %v2541_v24, %v1188_v29  ;;  %v1234_v18 = vpack.c.bf16 %v2551_v2, %v2549_v53 }
 0x303   : > { %v1121_v33 = vmul.f32 1.442695, %v4545_v59  ;;  %v1125_v22 = vmul.f32 1.442695, %v4547_v32  ;;  %v2555_v25 = vpop.eup %2554  ;;  %2574 = vpow2.f32 %v1113_v54  ;;  %v4548_v26 = vsub.f32 %v4505_v40, %v3187_v31 }
 0x304   : > { %v4550_v51 = vsub.f32 %v4549_v30, %v3187_v31  ;;  %v4551_v4 = vpack.c.bf16 %v3310_v19, %v3303_v41  ;;  %v2557_v23 = vpop.eup %2556  ;;  %v1169_v48 = vadd.f32 %v3438_v50, %v1168_v43  ;;  %2576 = vpow2.f32 %v1117_v3 }
 0x305   : > { %v1129_v6 = vmul.f32 1.442695, %v4548_v26  ;;  %v1190_v24 = vadd.f32 %v2543_v34, %v1189_v62  ;;  %v1236_v7 = vpack.c.bf16 %v2555_v25, %v2553_v11  ;;  %v2559_v54 = vpop.eup %2558  ;;  %2578 = vpow2.f32 %v1121_v33  ;;  %v4554_v34 = vld [vmem:[#allocation29_spill] sm:$0xff] }
 0x306   : > { %v1133_v13 = vmul.f32 1.442695, %v4550_v51  ;;  %1260 = vmatpush1.bf16.msra.mxu0 %v4551_v4  ;;  %v4552_v40 = vsub.f32 %v4507_v5, %v3187_v31  ;;  %v4553_v44 = vsub.f32 %v4508_v52, %v3187_v31  ;;  %v2561_v29 = vpop.eup %2560  ;;  %v1170_v19 = vadd.f32 %v3446_v35, %v1169_v48 }
 0x307   : > { %1261 = vmatprep.subr.bf16.mxu0 %v1230_v36  ;;  %2580 = vpow2.f32 %v1125_v22  ;;  %v1191_v41 = vadd.f32 %v2545_v27, %v1190_v24  ;;  %v1238_v59 = vpack.c.bf16 %v2559_v54, %v2557_v23  ;;  %v2563_v3 = vpop.eup %2562  ;;  %v4555_v36 = vsub.f32 %v4554_v34, %v3187_v31 }
 0x308   : > { %v1137_v8 = vmul.f32 1.442695, %v4552_v40  ;;  %v1141_v37 = vmul.f32 1.442695, %v4553_v44  ;;  %2582 = vpow2.f32 %v1129_v6  ;;  %v4556_v5 = vpack.c.bf16 %v3325_v55, %v3318_v63  ;;  %v2565_v28 = vpop.eup %2564 }
 0x309   : > { %v1145_v33 = vmul.f32 1.442695, %v4555_v36  ;;  %v1171_v52 = vadd.f32 %v3453_v20, %v1170_v19  ;;  %2584 = vpow2.f32 %v1133_v13  ;;  %v1192_v32 = vadd.f32 %v2547_v57, %v1191_v41  ;;  %v2567_v22 = vpop.eup %2566 }
 0x30a   : > { %1262 = vmatpush1.bf16.msra.mxu0 %v4556_v5  ;;  %v1240_v43 = vpack.c.bf16 %v2563_v3, %v2561_v29  ;;  %2586 = vpow2.f32 %v1137_v8  ;;  %v2569_v27 = vpop.eup %2568  ;;  %v1242_v31 = vpack.c.bf16 %v2567_v22, %v2565_v28  ;;  %v4557_v55 = vpack.c.bf16 %v3340_v56, %v3333_v1 }
 0x30b   : > { %1263 = vmatprep.subr.bf16.mxu0 %v1232_v49  ;;  %v1172_v62 = vadd.f32 %v3461_v61, %v1171_v52  ;;  %2588 = vpow2.f32 %v1141_v37  ;;  %v1193_v26 = vadd.f32 %v2549_v53, %v1192_v32  ;;  %v2571_v6 = vpop.eup %2570  ;;  %v4558_v40 = vpack.c.bf16 %v3354_v60, %v3348_v10 }
 0x30c   : > { %2590 = vpow2.f32 %v1145_v33  ;;  %v2573_v63 = vpop.eup %2572  ;;  %v1244_v49 = vpack.c.bf16 %v2571_v6, %v2569_v27  ;;  %v4560_v52 = vpack.c.bf16 %v3379_v46, %v3373_v9  ;;  %v4564_v9 = vpack.c.bf16 %v3418_v16, %v3409_v15 }
 0x30d   : > { %v1173_v30 = vadd.f32 %v3468_v21, %v1172_v62  ;;  %v1194_v57 = vadd.f32 %v2551_v2, %v1193_v26  ;;  %v2575_v51 = vpop.eup %2574  ;;  %v4567_v15 = vpack.c.bf16 %v3468_v21, %v3461_v61  ;;  %v4572_v21 = vld [vmem:[#allocation7_spill] sm:$0xff] }
 0x30e   : > { %1264 = vmatpush1.bf16.msra.mxu0 %v4557_v55  ;;  %v2577_v13 = vpop.eup %2576  ;;  %v1246_v24 = vpack.c.bf16 %v2575_v51, %v2573_v63  ;;  %v4571_v55 = vpack.c.bf16 %v3497_v39, %v3489_v58  ;;  %v599_v61 = vpack.c.bf16 %v4572_v21, %v4572_v21 }
 0x30f   : > { %1265 = vmatprep.subr.bf16.mxu0 %v1234_v18  ;;  %v1174_v4 = vadd.f32 %v3476_v17, %v1173_v30  ;;  %v1195_v48 = vadd.f32 %v2553_v11, %v1194_v57  ;;  %v2579_v53 = vpop.eup %2578  ;;  %v4559_v11 = vpack.c.bf16 %v3367_v45, %v3360_v14  ;;  %v4561_v14 = vld [vmem:[#allocation9_spill] sm:$0xff] }
 0x310   : > { %v1248_v44 = vpack.c.bf16 %v2579_v53, %v2577_v13  ;;  %v4562_v45 = vpack.c.bf16 %v3390_v12, %v4561_v14  ;;  %v4565_v12 = vpack.c.bf16 %v3438_v50, %v3429_v0  ;;  %v4568_v0 = vpack.c.bf16 %v3484_v38, %v3476_v17 }
 0x311   : > { %v2581_v8 = vpop.eup %2580  ;;  %v1175_v56 = vadd.f32 %v3484_v38, %v1174_v4  ;;  %v1196_v1 = vadd.f32 %v2555_v25, %v1195_v48  ;;  %v4573_v17 = vmov 0  }
 0x312   : > { %1266 = vmatpush1.bf16.msra.mxu0 %v4558_v40  ;;  %v2583_v2 = vpop.eup %2582 }
 0x313   : > { %1267 = vmatprep.subr.bf16.mxu0 %v1236_v7  ;;  %v2585_v18 = vpop.eup %2584  ;;  %v1176_v37 = vadd.f32 %v3489_v58, %v1175_v56  ;;  %v1197_v19 = vadd.f32 %v2557_v23, %v1196_v1  ;;  %v1250_v41 = vpack.c.bf16 %v2583_v2, %v2581_v8 }
 0x314   : > { %v2587_v34 = vpop.eup %2586 }
 0x315   : > { %v2589_v36 = vpop.eup %2588  ;;  %v3595_v60 = vadd.f32 %v3497_v39, %v1176_v37  ;;  %v1198_v10 = vadd.f32 %v2559_v54, %v1197_v19  ;;  %v1252_v25 = vpack.c.bf16 %v2587_v34, %v2585_v18  ;;  %v4563_v54 = vpack.c.bf16 %v3401_v42, %v3395_v47 }
 0x316   : > { %1268 = vmatpush1.bf16.msra.mxu0 %v4559_v11  ;;  %v2591_v7 = vpop.eup %2590  ;;  %v4566_v47 = vpack.c.bf16 %v3453_v20, %v3446_v35  ;;  %v4570_v20 = vld [vmem:[#allocation6_spill] sm:$0xff] }
 0x317   : > { %1269 = vmatprep.subr.bf16.mxu0 %v1238_v59  ;;  %v1199_v33 = vadd.f32 %v2561_v29, %v1198_v10  ;;  %v1254_v5 = vpack.c.bf16 %v2591_v7, %v2589_v36 }
 0x319   : > { %v1200_v23 = vadd.f32 %v2563_v3, %v1199_v33 }
 0x31a   : > { %1270 = vmatpush1.bf16.msra.mxu0 %v4560_v52 }
 0x31b   : > { %1271 = vmatprep.subr.bf16.mxu0 %v1240_v43  ;;  %v1201_v32 = vadd.f32 %v2565_v28, %v1200_v23 }
 0x31d   : > { %v1202_v62 = vadd.f32 %v2567_v22, %v1201_v32 }
 0x31e   : > { %1272 = vmatpush1.bf16.msra.mxu0 %v4562_v45 }
 0x31f   : > { %1273 = vmatprep.subr.bf16.mxu0 %v1242_v31  ;;  %v1203_v26 = vadd.f32 %v2569_v27, %v1202_v62  ;;  %v4569_v31 = vld [vmem:[#allocation5_spill] sm:$0xff] }
 0x320   : > { %v1298_v35 = vpack.c.bf16 %v4569_v31, %v4569_v31 }
 0x321   : > { %v1204_v29 = vadd.f32 %v2571_v6, %v1203_v26  ;;  %v1299_v6 = vpack.c.bf16 %v4570_v20, %v4570_v20 }
 0x322   : > { %1274 = vmatpush1.bf16.msra.mxu0 %v4563_v54  ;;  %v1385_v38 = vsel %vm347_vm0, %v1298_v35, 0 }
 0x323   : > { %1275 = vmatprep.subr.bf16.mxu0 %v1244_v49  ;;  %v1205_v59 = vadd.f32 %v2573_v63, %v1204_v29  ;;  %v1312_v63 = vpop.trf.xlu1 }
 0x325   : > { %v1206_v46 = vadd.f32 %v2575_v51, %v1205_v59 }
 0x326   : > { %1276 = vmatpush1.bf16.msra.mxu0 %v4564_v9 }
 0x327   : > { %1277 = vmatprep.subr.bf16.mxu0 %v1246_v24  ;;  %v1207_v3 = vadd.f32 %v2577_v13, %v1206_v46  ;;  %v1313_v30 = vpop.trf.xlu1 }
 0x329   : > { %v1208_v28 = vadd.f32 %v2579_v53, %v1207_v3 }
 0x32a   : > { %1278 = vmatpush1.bf16.msra.mxu0 %v4565_v12 }
 0x32b   : > { %1279 = vmatprep.subr.bf16.mxu0 %v1248_v44  ;;  %v1209_v43 = vadd.f32 %v2581_v8, %v1208_v28  ;;  %v1314_v58 = vpop.trf.xlu1  ;;  %v1178_v44 = vrot.slane %v3595_v60, 4 }
 0x32d   : > { %v1210_v42 = vadd.f32 %v2583_v2, %v1209_v43 }
 0x32e   : > { %1280 = vmatpush1.bf16.msra.mxu0 %v4566_v47 }
 0x32f   : > { %1281 = vmatprep.subr.bf16.mxu0 %v1250_v41  ;;  %v1211_v22 = vadd.f32 %v2585_v18, %v1210_v42  ;;  %v1315_v39 = vpop.trf.xlu1  ;;  %v1179_v18 = vadd.f32 %v1178_v44, %v3595_v60 }
 0x331   : > { %v1212_v16 = vadd.f32 %v2587_v34, %v1211_v22  ;;  %v1180_v19 = vrot.slane %v1179_v18, 2 }
 0x332   : > { %1282 = vmatpush1.bf16.msra.mxu0 %v4567_v15 }
 0x333   : > { %1283 = vmatprep.subr.bf16.mxu0 %v1252_v25  ;;  %v1213_v27 = vadd.f32 %v2589_v36, %v1212_v16  ;;  %v1316_v57 = vpop.trf.xlu1  ;;  %v1181_v34 = vadd.f32 %v1180_v19, %v1179_v18 }
 0x335   : > { %v1214_v50 = vadd.f32 %v2591_v7, %v1213_v27  ;;  %v1182_v36 = vrot.slane %v1181_v34, 1 }
 0x336   : > { %1284 = vmatpush1.bf16.msra.mxu0 %v4568_v0 }
 0x337   : > { %1285 = vmatprep.subr.bf16.mxu0 %v1254_v5  ;;  %v1317_v49 = vpop.trf.xlu1  ;;  %v1215_v2 = vrot.slane %v1214_v50, 4  ;;  %v1183_v25 = vadd.f32 %v1182_v36, %v1181_v34 }
 0x339   : > { %v1216_v37 = vadd.f32 %v1215_v2, %v1214_v50  ;;  %2592 = vrcp.f32 %v1183_v25 }
 0x33a   : > { %1286 = vmatpush1.bf16.msra.mxu0 %v4571_v55 }
 0x33b   : > { %2377 = vmatprep.subr.msk.bf16.mxu0 %vm347_vm0, %v1299_v6  ;;  %v1318_v51 = vpop.trf.xlu1  ;;  %v1217_v41 = vrot.slane %v1216_v37, 2 }
 0x33d   : > { %1288 = vmatmul.mubr.bf16.vlgmr.msra.gmra.mrb[0].mxu0 %v599_v61  ;;  %v1218_v11 = vadd.f32 %v1217_v41, %v1216_v37 }
 0x33e   : > { %1391 = vmatpush1.bf16.msra.mxu0 %v1385_v38  ;;  %1422 = vmatprep.mubr.bf16.mxu0 %v4573_v17 }
 0x33f   : > { %v1319_v13 = vpop.trf.xlu1  ;;  %v1219_v10 = vrot.slane %v1218_v11, 1 }
 0x341   : > { %v1220_v7 = vadd.f32 %v1219_v10, %v1218_v11 }
 0x343   : > { %v1328_v4 = vpop.trf.xlu1  ;;  %2594 = vrcp.f32 %v1220_v7  ;;  %v2593_v33 = vpop.eup %2592 }
 0x345   : > { %2378 = vmatmul.mubr.msk.bf16.vlgmr.msra.gmra.mrb[4].mxu0 %vm633_vm2, %v1312_v63 }
 0x346   : > { %1432 = vmatprep.mubr.bf16.mxu0 %v4573_v17 }
 0x347   : > { %v1329_v48 = vpop.trf.xlu1 }
 0x34b   : > { %v1330_v24 = vpop.trf.xlu1 }
 0x34d   : > { %2379 = vmatmul.mubr.msk.bf16.gmra.mrb[8].mxu0 %vm633_vm2, %v1313_v30  ;;  %v2595_v52 = vpop.eup %2594 }
 0x34e   : > { %1442 = vmatprep.mubr.bf16.mxu0 %v4573_v17 }
 0x34f   : > { %v1331_v53 = vpop.trf.xlu1 }
 0x353   : > { %v1332_v40 = vpop.trf.xlu1 }
 0x355   : > { %2380 = vmatmul.mubr.msk.bf16.gmra.mrb[12].mxu0 %vm633_vm2, %v1314_v58 }
 0x356   : > { %1452 = vmatprep.mubr.bf16.mxu0 %v4573_v17 }
 0x357   : > { %v1333_v8 = vpop.trf.xlu1 }
 0x35b   : > { %v1334_v56 = vpop.trf.xlu1 }
 0x35d   : > { %2381 = vmatmul.mubr.msk.bf16.gmra.mrb[16].mxu0 %vm633_vm2, %v1315_v39 }
 0x35e   : > { %1462 = vmatprep.mubr.bf16.mxu0 %v4573_v17 }
 0x35f   : > { %v1335_v1 = vpop.trf.xlu1 }
 0x365   : > { %2382 = vmatmul.mubr.msk.bf16.gmra.mrb[20].mxu0 %vm633_vm2, %v1316_v57 }
 0x366   : > { %1472 = vmatprep.mubr.bf16.mxu0 %v4573_v17 }
 0x36d   : > { %2383 = vmatmul.mubr.msk.bf16.gmra.mrb[24].mxu0 %vm633_vm2, %v1317_v49 }
 0x36e   : > { %1482 = vmatprep.mubr.bf16.mxu0 %v4573_v17 }
 0x375   : > { %2384 = vmatmul.mubr.msk.bf16.gmra.mrb[28].mxu0 %vm633_vm2, %v1318_v51 }
 0x376   : > { %1492 = vmatprep.mubr.bf16.mxu0 %v4573_v17 }
 0x37d   : > { %2385 = vmatmul.mubr.msk.bf16.gmra.mrb[32].mxu0 %vm633_vm2, %v1319_v13 }
 0x37e   : > { %1502 = vmatprep.mubr.bf16.mxu0 %v4573_v17 }
 0x385   : > { %2386 = vmatmul.mubr.msk.bf16.gmra.mrb[36].mxu0 %vm633_vm2, %v1328_v4 }
 0x386   : > { %1512 = vmatprep.mubr.bf16.mxu0 %v4573_v17 }
 0x38d   : > { %2387 = vmatmul.mubr.msk.bf16.gmra.mrb[40].mxu0 %vm633_vm2, %v1329_v48 }
 0x38e   : > { %1522 = vmatprep.mubr.bf16.mxu0 %v4573_v17 }
 0x395   : > { %2388 = vmatmul.mubr.msk.bf16.gmra.mrb[44].mxu0 %vm633_vm2, %v1330_v24 }
 0x396   : > { %1532 = vmatprep.mubr.bf16.mxu0 %v4573_v17 }
 0x39d   : > { %2389 = vmatmul.mubr.msk.bf16.gmra.mrb[48].mxu0 %vm633_vm2, %v1331_v53 }
 0x39e   : > { %1542 = vmatprep.mubr.bf16.mxu0 %v4573_v17 }
 0x3a5   : > { %2390 = vmatmul.mubr.msk.bf16.gmra.mrb[52].mxu0 %vm633_vm2, %v1332_v40 }
 0x3a6   : > { %1552 = vmatprep.mubr.bf16.mxu0 %v4573_v17 }
 0x3ad   : > { %2391 = vmatmul.mubr.msk.bf16.gmra.mrb[56].mxu0 %vm633_vm2, %v1333_v8 }
 0x3ae   : > { %1562 = vmatprep.mubr.bf16.mxu0 %v4573_v17 }
 0x3b5   : > { %2392 = vmatmul.mubr.msk.bf16.gmra.mrb[60].mxu0 %vm633_vm2, %v1334_v56 }
 0x3b6   : > { %1572 = vmatprep.mubr.bf16.mxu0 %v4573_v17 }
 0x3bd   : > { %2393 = vmatmul.mubr.msk.bf16.gmra.mrb[64].mxu0 %vm633_vm2, %v1335_v1 }
 0x410   : > { %v1289_v5 = vpop.f32.mrb[0].mxu0 }
 0x411   : > { %v3666_v23 = vmul.f32 %v2593_v33, %v1289_v5  ;;  %v1291_v32 = vpop.f32.mrb[1].mxu0 }
 0x412   : > { %v3668_v14 = vmul.f32 %v2595_v52, %v1291_v32  ;;  %v1293_v60 = vpop.f32.mrb[2].mxu0 }
 0x413   : > { %4574 = vst [vmem:[#allocation10_spill] sm:$0xff] %v3666_v23  ;;  %v1294_v45 = vpop.f32.mrb[3].mxu0 }
 0x414   : > { %4575 = vst [vmem:[#allocation11_spill] sm:$0xff] %v3668_v14 }
 0x418   : > { %v3670_v62 = vpop.f32.mrb[4].mxu0 }
 0x419   : > { %v3672_v26 = vpop.f32.mrb[5].mxu0 }
 0x41a   : > { %v3674_v54 = vpop.f32.mrb[6].mxu0 }
 0x41b   : > { %v3676_v29 = vpop.f32.mrb[7].mxu0 }
 0x420   : > { %v3678_v59 = vpop.f32.mrb[8].mxu0 }
 0x421   : > { %v1583_v9 = vmax.f32 %v3670_v62, %v3678_v59  ;;  %v3682_v46 = vpop.f32.mrb[9].mxu0 }
 0x422   : > { %v1620_v3 = vmax.f32 %v3672_v26, %v3682_v46  ;;  %v3686_v12 = vpop.f32.mrb[10].mxu0 }
 0x423   : > { %v1584_v28 = vmax.f32 %v3674_v54, %v3686_v12  ;;  %v3690_v43 = vpop.f32.mrb[11].mxu0 }
 0x424   : > { %v1621_v47 = vmax.f32 %v3676_v29, %v3690_v43 }
 0x428   : > { %v3694_v42 = vpop.f32.mrb[12].mxu0 }
 0x429   : > { %v1585_v22 = vmax.f32 %v1583_v9, %v3694_v42  ;;  %v3697_v15 = vpop.f32.mrb[13].mxu0 }
 0x42a   : > { %v1622_v16 = vmax.f32 %v1620_v3, %v3697_v15  ;;  %v3700_v27 = vpop.f32.mrb[14].mxu0 }
 0x42b   : > { %v1586_v0 = vmax.f32 %v1584_v28, %v3700_v27  ;;  %v3703_v50 = vpop.f32.mrb[15].mxu0 }
 0x42c   : > { %v1623_v31 = vmax.f32 %v1621_v47, %v3703_v50 }
 0x430   : > { %v3706_v35 = vpop.f32.mrb[16].mxu0 }
 0x431   : > { %v1587_v20 = vmax.f32 %v1585_v22, %v3706_v35  ;;  %v3709_v6 = vpop.f32.mrb[17].mxu0 }
 0x432   : > { %v1624_v55 = vmax.f32 %v1622_v16, %v3709_v6  ;;  %v3712_v21 = vpop.f32.mrb[18].mxu0 }
 0x433   : > { %v1588_v61 = vmax.f32 %v1586_v0, %v3712_v21  ;;  %v3715_v38 = vpop.f32.mrb[19].mxu0 }
 0x434   : > { %v1625_v17 = vmax.f32 %v1623_v31, %v3715_v38 }
 0x438   : > { %v3718_v63 = vpop.f32.mrb[20].mxu0 }
 0x439   : > { %v1589_v30 = vmax.f32 %v1587_v20, %v3718_v63  ;;  %v3721_v58 = vpop.f32.mrb[21].mxu0 }
 0x43a   : > { %v1626_v39 = vmax.f32 %v1624_v55, %v3721_v58  ;;  %v3724_v57 = vpop.f32.mrb[22].mxu0 }
 0x43b   : > { %v1590_v49 = vmax.f32 %v1588_v61, %v3724_v57  ;;  %v3727_v51 = vpop.f32.mrb[23].mxu0 }
 0x43c   : > { %v1627_v13 = vmax.f32 %v1625_v17, %v3727_v51 }
 0x440   : > { %v3730_v4 = vpop.f32.mrb[24].mxu0 }
 0x441   : > { %v1591_v48 = vmax.f32 %v1589_v30, %v3730_v4  ;;  %v3733_v24 = vpop.f32.mrb[25].mxu0 }
 0x442   : > { %v1628_v53 = vmax.f32 %v1626_v39, %v3733_v24  ;;  %v3736_v40 = vpop.f32.mrb[26].mxu0 }
 0x443   : > { %v1592_v8 = vmax.f32 %v1590_v49, %v3736_v40  ;;  %v3739_v56 = vpop.f32.mrb[27].mxu0 }
 0x444   : > { %v1629_v1 = vmax.f32 %v1627_v13, %v3739_v56 }
 0x448   : > { %v3742_v44 = vpop.f32.mrb[28].mxu0 }
 0x449   : > { %v1593_v2 = vmax.f32 %v1591_v48, %v3742_v44  ;;  %v3745_v18 = vpop.f32.mrb[29].mxu0 }
 0x44a   : > { %v1630_v37 = vmax.f32 %v1628_v53, %v3745_v18  ;;  %v3748_v19 = vpop.f32.mrb[30].mxu0 }
 0x44b   : > { %v1594_v41 = vmax.f32 %v1592_v8, %v3748_v19  ;;  %v3751_v34 = vpop.f32.mrb[31].mxu0 }
 0x44c   : > { %v1631_v11 = vmax.f32 %v1629_v1, %v3751_v34 }
 0x450   : > { %v3754_v36 = vpop.f32.mrb[32].mxu0 }
 0x451   : > { %v1595_v10 = vmax.f32 %v1593_v2, %v3754_v36  ;;  %v3757_v25 = vpop.f32.mrb[33].mxu0 }
 0x452   : > { %4576 = vst [vmem:[#allocation12_spill] sm:$0xff] %v3757_v25  ;;  %v1632_v7 = vmax.f32 %v1630_v37, %v3757_v25  ;;  %v3760_v33 = vpop.f32.mrb[34].mxu0 }
 0x453   : > { %v1596_v5 = vmax.f32 %v1594_v41, %v3760_v33  ;;  %v3763_v52 = vpop.f32.mrb[35].mxu0 }
 0x454   : > { %4577 = vst [vmem:[#allocation13_spill] sm:$0xff] %v3763_v52  ;;  %v1633_v32 = vmax.f32 %v1631_v11, %v3763_v52 }
 0x458   : > { %v3766_v60 = vpop.f32.mrb[36].mxu0 }
 0x459   : > { %v1597_v45 = vmax.f32 %v1595_v10, %v3766_v60  ;;  %v3769_v9 = vpop.f32.mrb[37].mxu0 }
 0x45a   : > { %4578 = vst [vmem:[#allocation14_spill] sm:$0xff] %v3769_v9  ;;  %v1634_v3 = vmax.f32 %v1632_v7, %v3769_v9  ;;  %v3772_v28 = vpop.f32.mrb[38].mxu0 }
 0x45b   : > { %v1598_v47 = vmax.f32 %v1596_v5, %v3772_v28  ;;  %v3775_v22 = vpop.f32.mrb[39].mxu0 }
 0x45c   : > { %4579 = vst [vmem:[#allocation15_spill] sm:$0xff] %v3775_v22  ;;  %v1635_v16 = vmax.f32 %v1633_v32, %v3775_v22 }
 0x460   : > { %v3778_v0 = vpop.f32.mrb[40].mxu0 }
 0x461   : > { %v1599_v31 = vmax.f32 %v1597_v45, %v3778_v0  ;;  %v3781_v20 = vpop.f32.mrb[41].mxu0 }
 0x462   : > { %4580 = vst [vmem:[#allocation16_spill] sm:$0xff] %v3781_v20  ;;  %v1636_v55 = vmax.f32 %v1634_v3, %v3781_v20  ;;  %v3784_v61 = vpop.f32.mrb[42].mxu0 }
 0x463   : > { %v1600_v17 = vmax.f32 %v1598_v47, %v3784_v61  ;;  %v3787_v30 = vpop.f32.mrb[43].mxu0 }
 0x464   : > { %4581 = vst [vmem:[#allocation17_spill] sm:$0xff] %v3787_v30  ;;  %v1637_v39 = vmax.f32 %v1635_v16, %v3787_v30 }
 0x468   : > { %v3790_v49 = vpop.f32.mrb[44].mxu0 }
 0x469   : > { %v1601_v13 = vmax.f32 %v1599_v31, %v3790_v49  ;;  %v3793_v48 = vpop.f32.mrb[45].mxu0 }
 0x46a   : > { %4582 = vst [vmem:[#allocation18_spill] sm:$0xff] %v3793_v48  ;;  %v1638_v53 = vmax.f32 %v1636_v55, %v3793_v48  ;;  %v3796_v8 = vpop.f32.mrb[46].mxu0 }
 0x46b   : > { %v1602_v1 = vmax.f32 %v1600_v17, %v3796_v8  ;;  %v3799_v2 = vpop.f32.mrb[47].mxu0 }
 0x46c   : > { %4583 = vst [vmem:[#allocation19_spill] sm:$0xff] %v3799_v2  ;;  %v1639_v37 = vmax.f32 %v1637_v39, %v3799_v2 }
 0x470   : > { %v3802_v41 = vpop.f32.mrb[48].mxu0 }
 0x471   : > { %v1603_v11 = vmax.f32 %v1601_v13, %v3802_v41  ;;  %v3805_v10 = vpop.f32.mrb[49].mxu0 }
 0x472   : > { %4584 = vst [vmem:[#allocation20_spill] sm:$0xff] %v3805_v10  ;;  %v1640_v7 = vmax.f32 %v1638_v53, %v3805_v10  ;;  %v3808_v5 = vpop.f32.mrb[50].mxu0 }
 0x473   : > { %v1604_v32 = vmax.f32 %v1602_v1, %v3808_v5  ;;  %v3811_v45 = vpop.f32.mrb[51].mxu0 }
 0x474   : > { %4585 = vst [vmem:[#allocation21_spill] sm:$0xff] %v3811_v45  ;;  %v1641_v3 = vmax.f32 %v1639_v37, %v3811_v45 }
 0x478   : > { %v3814_v47 = vpop.f32.mrb[52].mxu0 }
 0x479   : > { %v1605_v16 = vmax.f32 %v1603_v11, %v3814_v47  ;;  %v3817_v31 = vpop.f32.mrb[53].mxu0 }
 0x47a   : > { %4586 = vst [vmem:[#allocation22_spill] sm:$0xff] %v3817_v31  ;;  %v1642_v55 = vmax.f32 %v1640_v7, %v3817_v31  ;;  %v3820_v17 = vpop.f32.mrb[54].mxu0 }
 0x47b   : > { %v1606_v39 = vmax.f32 %v1604_v32, %v3820_v17  ;;  %v3823_v13 = vpop.f32.mrb[55].mxu0 }
 0x47c   : > { %4587 = vst [vmem:[#allocation23_spill] sm:$0xff] %v3823_v13  ;;  %v1643_v53 = vmax.f32 %v1641_v3, %v3823_v13 }
 0x480   : > { %v3826_v1 = vpop.f32.mrb[56].mxu0 }
 0x481   : > { %v1607_v37 = vmax.f32 %v1605_v16, %v3826_v1  ;;  %v3829_v23 = vpop.f32.mrb[57].mxu0 }
 0x482   : > { %4588 = vst [vmem:[#allocation25_spill] sm:$0xff] %v3829_v23  ;;  %v1644_v11 = vmax.f32 %v1642_v55, %v3829_v23  ;;  %v3832_v14 = vpop.f32.mrb[58].mxu0 }
 0x483   : > { %v1608_v7 = vmax.f32 %v1606_v39, %v3832_v14  ;;  %v3835_v31 = vpop.f32.mrb[59].mxu0 }
 0x484   : > { %4589 = vst [vmem:[#allocation27_spill] sm:$0xff] %v3835_v31  ;;  %v1645_v32 = vmax.f32 %v1643_v53, %v3835_v31 }
 0x488   : > { %v3838_v45 = vpop.f32.mrb[60].mxu0 }
 0x489   : > { %v1609_v3 = vmax.f32 %v1607_v37, %v3838_v45  ;;  %v3841_v13 = vpop.f32.mrb[61].mxu0 }
 0x48a   : > { %4590 = vst [vmem:[#allocation28_spill] sm:$0xff] %v3841_v13  ;;  %v1646_v16 = vmax.f32 %v1644_v11, %v3841_v13  ;;  %v3844_v10 = vpop.f32.mrb[62].mxu0 }
 0x48b   : > { %v1610_v55 = vmax.f32 %v1608_v7, %v3844_v10  ;;  %v3847_v23 = vpop.f32.mrb[63].mxu0 }
 0x48c   : > { %4591 = vst [vmem:[#allocation24_spill] sm:$0xff] %v3847_v23  ;;  %v1647_v39 = vmax.f32 %v1645_v32, %v3847_v23 }
 0x490   : > { %v3850_v2 = vpop.f32.mrb[64].mxu0 }
 0x491   : > { %v1611_v53 = vmax.f32 %v1609_v3, %v3850_v2  ;;  %v3853_v31 = vpop.f32.mrb[65].mxu0  ;;  %v3865_v3 = vld [vmem:[%s4375_s4] sm:$0xf] }
 0x492   : > { %4592 = vst [vmem:[#allocation26_spill] sm:$0xff] %v3853_v31  ;;  %v1648_v37 = vmax.f32 %v1646_v16, %v3853_v31  ;;  %v3856_v48 = vpop.f32.mrb[66].mxu0  ;;  %4594 = vst [vmem:[#allocation9_spill] sm:$0xff] %v3865_v3  ;;  %2001 = vrot.lane.b32.xlu0 %v3865_v3, %s2810_s22  ;;  %s2732_s22 = sshll.u32 %s2811_s21, 4  ;;  %s2733_s22 = int_to_ptr.vmem [resolvable:$false] %s2732_s22 }
 0x493   : > { %v1612_v11 = vmax.f32 %v1610_v55, %v3856_v48  ;;  %v3859_v13 = vpop.f32.mrb[67].mxu0  ;;  %s2734_s30 = scalar_lea.vmem %s2733_s22, 256  ;;  %p2735_p1 = scmp.lt.s32.totalorder %s2201_s18, %s2733_s22 }
 0x494   : > { %4593 = vst [vmem:[#allocation29_spill] sm:$0xff] %v3859_v13  ;;  %v1649_v7 = vmax.f32 %v1647_v39, %v3859_v13  ;;  %p2736_p2 = scmp.lt.s32.totalorder %s2734_s30, %s2728_s20 }
 0x495   : > { %v1613_v30 = vmax.f32 %v1611_v53, %v1612_v11 }
 0x496   : > { %v1650_v20 = vmax.f32 %v1648_v37, %v1649_v7  ;;  %p2737_p3 = por %p2736_p2, %p2735_p1 }
 0x497   : > { %v1614_v22 = vrot.slane %v1613_v30, 4 }
 0x498   : > { %v1651_v32 = vrot.slane %v1650_v20, 4  ;;  %p2738_p5 = pnand %p2737_p3, %p2731_p0 }
 0x499   : > { %v1615_v23 = vmax.f32 %v1613_v30, %v1614_v22  ;;  %v4611_v3 = vld [vmem:[#allocation26_spill] sm:$0xff] }
 0x49a   : > { %v1652_v9 = vmax.f32 %v1650_v20, %v1651_v32 }
 0x49b   : > { %v1616_v52 = vrot.slane %v1615_v23, 2 }
 0x49c   : > { %v1653_v16 = vrot.slane %v1652_v9, 2 }
 0x49d   : > { %v1617_v55 = vmax.f32 %v1615_v23, %v1616_v52 }
 0x49e   : > { %v1654_v31 = vmax.f32 %v1652_v9, %v1653_v16 }
 0x49f   : > { %v1618_v25 = vrot.slane %v1617_v55, 1 }
 0x4a0   : > { %v1655_v39 = vrot.slane %v1654_v31, 1 }
 0x4a1   : > { %v3868_v53 = vmax.f32 %v1617_v55, %v1618_v25 }
 0x4a2   : > { %v3870_v37 = vmax.f32 %v1654_v31, %v1655_v39 }
 0x4a3   : > { %v1657_v22 = vsub.f32 %v3670_v62, %v3868_v53  ;;  %v1659_v20 = vsub.f32 %v3674_v54, %v3868_v53  ;;  %v1661_v30 = vsub.f32 %v3678_v59, %v3868_v53  ;;  %v1663_v11 = vsub.f32 %v3686_v12, %v3868_v53 }
 0x4a4   : > { %v1665_v23 = vsub.f32 %v3694_v42, %v3868_v53  ;;  %v1667_v25 = vsub.f32 %v3700_v27, %v3868_v53  ;;  %v1669_v52 = vsub.f32 %v3706_v35, %v3868_v53  ;;  %v1671_v62 = vsub.f32 %v3712_v21, %v3868_v53 }
 0x4a5   : > { %v1673_v54 = vsub.f32 %v3718_v63, %v3868_v53  ;;  %v1675_v59 = vsub.f32 %v3724_v57, %v3868_v53  ;;  %v1677_v12 = vsub.f32 %v3730_v4, %v3868_v53  ;;  %v1679_v42 = vsub.f32 %v3736_v40, %v3868_v53 }
 0x4a6   : > { %v1681_v27 = vsub.f32 %v3742_v44, %v3868_v53  ;;  %v1683_v35 = vsub.f32 %v3748_v19, %v3868_v53  ;;  %v1685_v21 = vsub.f32 %v3754_v36, %v3868_v53  ;;  %v1687_v63 = vsub.f32 %v3760_v33, %v3868_v53 }
 0x4a7   : > { %v1689_v57 = vsub.f32 %v3766_v60, %v3868_v53  ;;  %v1691_v4 = vsub.f32 %v3772_v28, %v3868_v53  ;;  %v1693_v40 = vsub.f32 %v3778_v0, %v3868_v53  ;;  %v1695_v44 = vsub.f32 %v3784_v61, %v3868_v53 }
 0x4a8   : > { %v1697_v19 = vsub.f32 %v3790_v49, %v3868_v53  ;;  %v1699_v36 = vsub.f32 %v3796_v8, %v3868_v53  ;;  %v1701_v33 = vsub.f32 %v3802_v41, %v3868_v53  ;;  %v1703_v60 = vsub.f32 %v3808_v5, %v3868_v53 }
 0x4a9   : > { %v1721_v31 = vmul.f32 1.442695, %v1657_v22  ;;  %v1725_v7 = vmul.f32 1.442695, %v1659_v20  ;;  %v1729_v32 = vmul.f32 1.442695, %v1661_v30 }
 0x4aa   : > { %v1733_v55 = vmul.f32 1.442695, %v1663_v11  ;;  %v1737_v49 = vmul.f32 1.442695, %v1665_v23  ;;  %v1741_v8 = vmul.f32 1.442695, %v1667_v25 }
 0x4ab   : > { %2596 = vpow2.f32 %v1721_v31  ;;  %v1745_v61 = vmul.f32 1.442695, %v1669_v52  ;;  %v1749_v41 = vmul.f32 1.442695, %v1671_v62  ;;  %v1753_v0 = vmul.f32 1.442695, %v1673_v54 }
 0x4ac   : > { %2598 = vpow2.f32 %v1725_v7  ;;  %v1757_v5 = vmul.f32 1.442695, %v1675_v59  ;;  %v1761_v22 = vmul.f32 1.442695, %v1677_v12  ;;  %v1765_v20 = vmul.f32 1.442695, %v1679_v42 }
 0x4ad   : > { %2600 = vpow2.f32 %v1729_v32  ;;  %v1769_v30 = vmul.f32 1.442695, %v1681_v27  ;;  %v1773_v16 = vmul.f32 1.442695, %v1683_v35  ;;  %v1777_v11 = vmul.f32 1.442695, %v1685_v21 }
 0x4ae   : > { %2602 = vpow2.f32 %v1733_v55  ;;  %v1781_v28 = vmul.f32 1.442695, %v1687_v63  ;;  %v1785_v39 = vmul.f32 1.442695, %v1689_v57  ;;  %v1789_v31 = vmul.f32 1.442695, %v1691_v4 }
 0x4af   : > { %2604 = vpow2.f32 %v1737_v49  ;;  %v1793_v23 = vmul.f32 1.442695, %v1693_v40  ;;  %v1797_v25 = vmul.f32 1.442695, %v1695_v44  ;;  %v1801_v7 = vmul.f32 1.442695, %v1697_v19 }
 0x4b0   : > { %2606 = vpow2.f32 %v1741_v8  ;;  %v3940_v52 = vmul.f32 1.442695, %v1699_v36  ;;  %v3942_v62 = vmul.f32 1.442695, %v1701_v33  ;;  %v3944_v54 = vmul.f32 1.442695, %v1703_v60 }
 0x4b1   : > { %2608 = vpow2.f32 %v1745_v61  ;;  %v4595_v49 = vld [vmem:[#allocation12_spill] sm:$0xff]  ;;  %v4597_v32 = vld [vmem:[#allocation14_spill] sm:$0xff]  ;;  %v4600_v8 = vld [vmem:[#allocation17_spill] sm:$0xff] }
 0x4b2   : > { %2610 = vpow2.f32 %v1749_v41  ;;  %v4596_v41 = vld [vmem:[#allocation13_spill] sm:$0xff]  ;;  %v4599_v60 = vld [vmem:[#allocation16_spill] sm:$0xff]  ;;  %v4601_v44 = vld [vmem:[#allocation18_spill] sm:$0xff] }
 0x4b3   : > { %2612 = vpow2.f32 %v1753_v0  ;;  %v4602_v40 = vld [vmem:[#allocation19_spill] sm:$0xff]  ;;  %v4603_v0 = vld [vmem:[#allocation20_spill] sm:$0xff]  ;;  %v4604_v63 = vld [vmem:[#allocation21_spill] sm:$0xff] }
 0x4b4   : > { %2614 = vpow2.f32 %v1757_v5  ;;  %v4605_v5 = vld [vmem:[#allocation22_spill] sm:$0xff]  ;;  %v4606_v27 = vld [vmem:[#allocation23_spill] sm:$0xff]  ;;  %v4610_v55 = vld [vmem:[#allocation24_spill] sm:$0xff] }
 0x4b5   : > { %v3954_v35 = vpop.eup %2596  ;;  %2616 = vpow2.f32 %v1761_v22 }
 0x4b6   : > { %v3962_v4 = vpop.eup %2598  ;;  %2618 = vpow2.f32 %v1765_v20 }
 0x4b7   : > { %v3970_v36 = vpop.eup %2600  ;;  %2620 = vpow2.f32 %v1769_v30  ;;  %v1849_v33 = vadd.f32 %v3962_v4, %v3954_v35  ;;  %v4598_v30 = vld [vmem:[#allocation15_spill] sm:$0xff] }
 0x4b8   : > { %v3978_v61 = vpop.eup %2602  ;;  %2622 = vpow2.f32 %v1773_v16  ;;  %v4608_v16 = vld [vmem:[#allocation27_spill] sm:$0xff] }
 0x4b9   : > { %v3986_v22 = vpop.eup %2604  ;;  %2624 = vpow2.f32 %v1777_v11  ;;  %v1850_v20 = vadd.f32 %v3970_v36, %v1849_v33 }
 0x4ba   : > { %v3993_v19 = vpop.eup %2606  ;;  %2626 = vpow2.f32 %v1781_v28 }
 0x4bb   : > { %v4001_v57 = vpop.eup %2608  ;;  %2628 = vpow2.f32 %v1785_v39  ;;  %v1851_v33 = vadd.f32 %v3978_v61, %v1850_v20 }
 0x4bc   : > { %v4008_v21 = vpop.eup %2610  ;;  %2630 = vpow2.f32 %v1789_v31 }
 0x4bd   : > { %v4016_v12 = vpop.eup %2612  ;;  %2632 = vpow2.f32 %v1793_v23  ;;  %v1852_v20 = vadd.f32 %v3986_v22, %v1851_v33  ;;  %v4612_v33 = vsub.f32 %v3814_v47, %v3868_v53 }
 0x4be   : > { %v4023_v9 = vpop.eup %2614  ;;  %2634 = vpow2.f32 %v1797_v25  ;;  %v4613_v25 = vsub.f32 %v3820_v17, %v3868_v53 }
 0x4bf   : > { %v4031_v42 = vpop.eup %2616  ;;  %2636 = vpow2.f32 %v1801_v7  ;;  %v1817_v28 = vmul.f32 1.442695, %v4612_v33  ;;  %v1853_v31 = vadd.f32 %v3993_v19, %v1852_v20  ;;  %v4614_v7 = vsub.f32 %v3826_v1, %v3868_v53 }
 0x4c0   : > { %v4037_v59 = vpop.eup %2618  ;;  %2638 = vpow2.f32 %v3940_v52  ;;  %v1821_v39 = vmul.f32 1.442695, %v4613_v25  ;;  %v4615_v52 = vsub.f32 %v3832_v14, %v3868_v53  ;;  %v4619_v14 = vsub.f32 %v3850_v2, %v3868_v53 }
 0x4c1   : > { %v4043_v11 = vpop.eup %2620  ;;  %2640 = vpow2.f32 %v3942_v62  ;;  %v1825_v23 = vmul.f32 1.442695, %v4614_v7  ;;  %v1854_v47 = vadd.f32 %v4001_v57, %v1853_v31  ;;  %v4616_v62 = vsub.f32 %v3838_v45, %v3868_v53 }
 0x4c2   : > { %v4050_v33 = vpop.eup %2622  ;;  %2642 = vpow2.f32 %v3944_v54  ;;  %v1829_v20 = vmul.f32 1.442695, %v4615_v52  ;;  %v4617_v31 = vsub.f32 %v3844_v10, %v3868_v53 }
 0x4c3   : > { %v4056_v17 = vpop.eup %2624  ;;  %2644 = vpow2.f32 %v1817_v28  ;;  %v1833_v25 = vmul.f32 1.442695, %v4616_v62  ;;  %v1855_v1 = vadd.f32 %v4008_v21, %v1854_v47  ;;  %v1841_v28 = vmul.f32 1.442695, %v4619_v14 }
 0x4c4   : > { %v4062_v7 = vpop.eup %2626  ;;  %2646 = vpow2.f32 %v1821_v39  ;;  %v1837_v54 = vmul.f32 1.442695, %v4617_v31  ;;  %v4620_v47 = vsub.f32 %v3856_v48, %v3868_v53  ;;  %v4623_v48 = vsub.f32 %v3682_v46, %v3870_v37 }
 0x4c5   : > { %v4067_v13 = vpop.eup %2628  ;;  %2648 = vpow2.f32 %v1825_v23  ;;  %v1856_v52 = vadd.f32 %v4016_v12, %v1855_v1  ;;  %v4621_v23 = vsub.f32 %v3672_v26, %v3870_v37  ;;  %v4622_v1 = vsub.f32 %v3676_v29, %v3870_v37 }
 0x4c6   : > { %4618 = vst [vmem:[#allocation5_spill] sm:$0xff] %v4067_v13  ;;  %v4073_v45 = vpop.eup %2630  ;;  %2650 = vpow2.f32 %v1829_v20  ;;  %v1845_v39 = vmul.f32 1.442695, %v4620_v47  ;;  %v1731_v53 = vmul.f32 1.442695, %v4623_v48  ;;  %v4624_v26 = vsub.f32 %v3690_v43, %v3870_v37 }
 0x4c7   : > { %v4078_v62 = vpop.eup %2632  ;;  %2652 = vpow2.f32 %v1833_v25  ;;  %v1857_v10 = vadd.f32 %v4023_v9, %v1856_v52  ;;  %v1723_v31 = vmul.f32 1.442695, %v4621_v23  ;;  %v1727_v20 = vmul.f32 1.442695, %v4622_v1 }
 0x4c8   : > { %v4084_v2 = vpop.eup %2634  ;;  %2654 = vpow2.f32 %v1837_v54  ;;  %v1735_v52 = vmul.f32 1.442695, %v4624_v26  ;;  %v4625_v54 = vsub.f32 %v3697_v15, %v3870_v37  ;;  %v4626_v29 = vsub.f32 %v3703_v50, %v3870_v37 }
 0x4c9   : > { %v4092_v14 = vpop.eup %2636  ;;  %2656 = vpow2.f32 %v1841_v28  ;;  %v1858_v25 = vadd.f32 %v4031_v42, %v1857_v10  ;;  %v4627_v28 = vsub.f32 %v3709_v6, %v3870_v37  ;;  %v4628_v10 = vsub.f32 %v3715_v38, %v3870_v37 }
 0x4ca   : > { %v1739_v47 = vmul.f32 1.442695, %v4625_v54  ;;  %v4101_v23 = vpop.eup %2638  ;;  %2658 = vpow2.f32 %v1845_v39  ;;  %v1743_v46 = vmul.f32 1.442695, %v4626_v29  ;;  %v4629_v39 = vsub.f32 %v3721_v58, %v3870_v37 }
 0x4cb   : > { %v1747_v1 = vmul.f32 1.442695, %v4627_v28  ;;  %v1751_v43 = vmul.f32 1.442695, %v4628_v10  ;;  %v4112_v48 = vpop.eup %2640  ;;  %v1859_v15 = vadd.f32 %v4037_v59, %v1858_v25  ;;  %2660 = vpow2.f32 %v1723_v31 }
 0x4cc   : > { %v1755_v26 = vmul.f32 1.442695, %v4629_v39  ;;  %v4630_v50 = vsub.f32 %v3727_v51, %v3870_v37  ;;  %v4121_v29 = vpop.eup %2642  ;;  %2662 = vpow2.f32 %v1727_v20 }
 0x4cd   : > { %v4129_v25 = vpop.eup %2644  ;;  %v1860_v58 = vadd.f32 %v4043_v11, %v1859_v15  ;;  %2664 = vpow2.f32 %v1731_v53 }
 0x4ce   : > { %v1759_v54 = vmul.f32 1.442695, %v4630_v50  ;;  %v4136_v28 = vpop.eup %2646  ;;  %2666 = vpow2.f32 %v1735_v52  ;;  %v4631_v52 = vsub.f32 %v3733_v24, %v3870_v37  ;;  %v4632_v50 = vsub.f32 %v3739_v56, %v3870_v37 }
 0x4cf   : > { %v4144_v15 = vpop.eup %2648  ;;  %v1861_v53 = vadd.f32 %v4050_v33, %v1860_v58  ;;  %2668 = vpow2.f32 %v1739_v47 }
 0x4d0   : > { %v4151_v51 = vpop.eup %2650  ;;  %2670 = vpow2.f32 %v1743_v46  ;;  %v1763_v20 = vmul.f32 1.442695, %v4631_v52  ;;  %v1767_v39 = vmul.f32 1.442695, %v4632_v50 }
 0x4d1   : > { %v4159_v58 = vpop.eup %2652  ;;  %v1862_v47 = vadd.f32 %v4056_v17, %v1861_v53  ;;  %2672 = vpow2.f32 %v1747_v1  ;;  %v4633_v1 = vsub.f32 %v3745_v18, %v3870_v37  ;;  %v4638_v18 = vsub.f32 %v4598_v30, %v3870_v37 }
 0x4d2   : > { %v4167_v31 = vpop.eup %2654  ;;  %2674 = vpow2.f32 %v1751_v43  ;;  %v4634_v43 = vsub.f32 %v3751_v34, %v3870_v37  ;;  %v4637_v34 = vsub.f32 %v4597_v32, %v3870_v37  ;;  %v4641_v30 = vsub.f32 %v4601_v44, %v3870_v37 }
 0x4d3   : > { %v4172_v10 = vpop.eup %2656  ;;  %v1863_v38 = vadd.f32 %v4062_v7, %v1862_v47  ;;  %2676 = vpow2.f32 %v1755_v26  ;;  %v1771_v24 = vmul.f32 1.442695, %v4633_v1  ;;  %v4635_v26 = vsub.f32 %v4595_v49, %v3870_v37 }
 0x4d4   : > { %v4180_v52 = vpop.eup %2658  ;;  %2678 = vpow2.f32 %v1759_v54  ;;  %v1775_v56 = vmul.f32 1.442695, %v4634_v43  ;;  %v4636_v54 = vsub.f32 %v4596_v41, %v3870_v37  ;;  %v1787_v43 = vmul.f32 1.442695, %v4637_v34 }
 0x4d5   : > { %v2661_v50 = vpop.eup %2660  ;;  %v1864_v46 = vadd.f32 %v4067_v13, %v1863_v38  ;;  %2680 = vpow2.f32 %v1763_v20  ;;  %v1779_v47 = vmul.f32 1.442695, %v4635_v26  ;;  %v4639_v41 = vsub.f32 %v4599_v60, %v3870_v37 }
 0x4d6   : > { %v2663_v1 = vpop.eup %2662  ;;  %2682 = vpow2.f32 %v1767_v39  ;;  %v1783_v53 = vmul.f32 1.442695, %v4636_v54  ;;  %v1791_v39 = vmul.f32 1.442695, %v4638_v18  ;;  %v1803_v18 = vmul.f32 1.442695, %v4641_v30 }
 0x4d7   : > { %v2665_v6 = vpop.eup %2664  ;;  %v1865_v38 = vadd.f32 %v4073_v45, %v1864_v46  ;;  %2684 = vpow2.f32 %v1771_v24  ;;  %v1886_v20 = vadd.f32 %v2663_v1, %v2661_v50  ;;  %v1926_v49 = vpack.c.bf16 %v2663_v1, %v2661_v50 }
 0x4d8   : > { %v2667_v26 = vpop.eup %2666  ;;  %2686 = vpow2.f32 %v1775_v56  ;;  %v1795_v54 = vmul.f32 1.442695, %v4639_v41  ;;  %v4640_v56 = vsub.f32 %v4600_v8, %v3870_v37  ;;  %v4642_v60 = vpack.c.bf16 %v3962_v4, %v3954_v35 }
 0x4d9   : > { %v2669_v13 = vpop.eup %2668  ;;  %v1866_v32 = vadd.f32 %v4078_v62, %v1865_v38  ;;  %2688 = vpow2.f32 %v1779_v47  ;;  %v1887_v34 = vadd.f32 %v2665_v6, %v1886_v20  ;;  %1957 = vmatprep.subr.bf16.mxu1 %v1926_v49  ;;  %v1928_v46 = vpack.c.bf16 %v2667_v26, %v2665_v6 }
 0x4da   : > { %v2671_v24 = vpop.eup %2670  ;;  %2690 = vpow2.f32 %v1783_v53  ;;  %v1799_v50 = vmul.f32 1.442695, %v4640_v56  ;;  %1958 = vmatpush1.bf16.msra.mxu1 %v4642_v60  ;;  %v4643_v8 = vsub.f32 %v4602_v40, %v3870_v37  ;;  %v4644_v44 = vsub.f32 %v4603_v0, %v3870_v37  ;;  %v4649_v60 = vld [vmem:[#allocation25_spill] sm:$0xff] }
 0x4db   : > { %v2673_v1 = vpop.eup %2672  ;;  %v1867_v47 = vadd.f32 %v4084_v2, %v1866_v32  ;;  %2692 = vpow2.f32 %v1787_v43  ;;  %v1888_v38 = vadd.f32 %v2667_v26, %v1887_v34  ;;  %1959 = vmatprep.subr.bf16.mxu1 %v1928_v46  ;;  %v1930_v6 = vpack.c.bf16 %v2671_v24, %v2669_v13 }
 0x4dc   : > { %v2675_v53 = vpop.eup %2674  ;;  %2694 = vpow2.f32 %v1791_v39  ;;  %v1807_v20 = vmul.f32 1.442695, %v4643_v8  ;;  %v1811_v49 = vmul.f32 1.442695, %v4644_v44  ;;  %v4645_v26 = vsub.f32 %v4604_v63, %v3870_v37 }
 0x4dd   : > { %v2677_v41 = vpop.eup %2676  ;;  %v1868_v35 = vadd.f32 %v4092_v14, %v1867_v47  ;;  %2696 = vpow2.f32 %v1795_v54  ;;  %v1889_v4 = vadd.f32 %v2669_v13, %v1888_v38  ;;  %v1932_v32 = vpack.c.bf16 %v2675_v53, %v2673_v1 }
 0x4de   : > { %v2679_v43 = vpop.eup %2678  ;;  %2698 = vpow2.f32 %v1799_v50  ;;  %v1815_v39 = vmul.f32 1.442695, %v4645_v26  ;;  %v4646_v40 = vsub.f32 %v4605_v5, %v3870_v37  ;;  %v4647_v0 = vpack.c.bf16 %v3978_v61, %v3970_v36 }
 0x4df   : > { %v2681_v46 = vpop.eup %2680  ;;  %v1869_v56 = vadd.f32 %v4101_v23, %v1868_v35  ;;  %2700 = vpow2.f32 %v1803_v18  ;;  %v1890_v13 = vadd.f32 %v2671_v24, %v1889_v4  ;;  %v1934_v54 = vpack.c.bf16 %v2679_v43, %v2677_v41 }
 0x4e0   : > { %v1819_v34 = vmul.f32 1.442695, %v4646_v40  ;;  %1960 = vmatpush1.bf16.msra.mxu1 %v4647_v0  ;;  %v2683_v50 = vpop.eup %2682  ;;  %2702 = vpow2.f32 %v1807_v20  ;;  %v4648_v63 = vsub.f32 %v4606_v27, %v3870_v37  ;;  %v4650_v5 = vsub.f32 %v4649_v60, %v3870_v37  ;;  %v4652_v20 = vld [vmem:[#allocation28_spill] sm:$0xff] }
 0x4e1   : > { %1961 = vmatprep.subr.bf16.mxu1 %v1930_v6  ;;  %v2685_v38 = vpop.eup %2684  ;;  %v1870_v36 = vadd.f32 %v4112_v48, %v1869_v56  ;;  %2704 = vpow2.f32 %v1811_v49  ;;  %v1891_v61 = vadd.f32 %v2673_v1, %v1890_v13  ;;  %v1936_v8 = vpack.c.bf16 %v2683_v50, %v2681_v46 }
 0x4e2   : > { %v1823_v30 = vmul.f32 1.442695, %v4648_v63  ;;  %v1827_v47 = vmul.f32 1.442695, %v4650_v5  ;;  %v2687_v18 = vpop.eup %2686  ;;  %2706 = vpow2.f32 %v1815_v39  ;;  %v4651_v24 = vsub.f32 %v4608_v16, %v3870_v37 }
 0x4e3   : > { %v4653_v27 = vsub.f32 %v4652_v20, %v3870_v37  ;;  %v4654_v35 = vpack.c.bf16 %v3993_v19, %v3986_v22  ;;  %v2689_v4 = vpop.eup %2688  ;;  %v1871_v26 = vadd.f32 %v4121_v29, %v1870_v36  ;;  %2708 = vpow2.f32 %v1819_v34 }
 0x4e4   : > { %v1831_v6 = vmul.f32 1.442695, %v4651_v24  ;;  %v1892_v1 = vadd.f32 %v2675_v53, %v1891_v61  ;;  %v1938_v49 = vpack.c.bf16 %v2687_v18, %v2685_v38  ;;  %v2691_v39 = vpop.eup %2690  ;;  %2710 = vpow2.f32 %v1823_v30  ;;  %v4657_v53 = vld [vmem:[#allocation29_spill] sm:$0xff] }
 0x4e5   : > { %v1835_v44 = vmul.f32 1.442695, %v4653_v27  ;;  %1962 = vmatpush1.bf16.msra.mxu1 %v4654_v35  ;;  %v4655_v16 = vsub.f32 %v4610_v55, %v3870_v37  ;;  %v4656_v0 = vsub.f32 %v4611_v3, %v3870_v37  ;;  %v2693_v13 = vpop.eup %2692  ;;  %v1872_v19 = vadd.f32 %v4129_v25, %v1871_v26 }
 0x4e6   : > { %1963 = vmatprep.subr.bf16.mxu1 %v1932_v32  ;;  %2712 = vpow2.f32 %v1827_v47  ;;  %v1893_v22 = vadd.f32 %v2677_v41, %v1892_v1  ;;  %v1940_v63 = vpack.c.bf16 %v2691_v39, %v2689_v4  ;;  %v2695_v34 = vpop.eup %2694  ;;  %v4658_v32 = vsub.f32 %v4657_v53, %v3870_v37 }
 0x4e7   : > { %v1839_v40 = vmul.f32 1.442695, %v4655_v16  ;;  %v1843_v56 = vmul.f32 1.442695, %v4656_v0  ;;  %2714 = vpow2.f32 %v1831_v6  ;;  %v4659_v55 = vpack.c.bf16 %v4008_v21, %v4001_v57  ;;  %v2697_v60 = vpop.eup %2696 }
 0x4e8   : > { %v1847_v30 = vmul.f32 1.442695, %v4658_v32  ;;  %v1873_v3 = vadd.f32 %v4136_v28, %v1872_v19  ;;  %2716 = vpow2.f32 %v1835_v44  ;;  %v1894_v5 = vadd.f32 %v2679_v43, %v1893_v22  ;;  %v2699_v47 = vpop.eup %2698 }
 0x4e9   : > { %1964 = vmatpush1.bf16.msra.mxu1 %v4659_v55  ;;  %v1942_v36 = vpack.c.bf16 %v2695_v34, %v2693_v13  ;;  %2718 = vpow2.f32 %v1839_v40  ;;  %v2701_v41 = vpop.eup %2700  ;;  %v1944_v37 = vpack.c.bf16 %v2699_v47, %v2697_v60  ;;  %v4660_v21 = vpack.c.bf16 %v4023_v9, %v4016_v12 }
 0x4ea   : > { %1965 = vmatprep.subr.bf16.mxu1 %v1934_v54  ;;  %v1874_v61 = vadd.f32 %v4144_v15, %v1873_v3  ;;  %2720 = vpow2.f32 %v1843_v56  ;;  %v1895_v24 = vadd.f32 %v2681_v46, %v1894_v5  ;;  %v2703_v6 = vpop.eup %2702  ;;  %v4661_v16 = vpack.c.bf16 %v4037_v59, %v4031_v42 }
 0x4eb   : > { %2722 = vpow2.f32 %v1847_v30  ;;  %v2705_v57 = vpop.eup %2704  ;;  %v1946_v54 = vpack.c.bf16 %v2703_v6, %v2701_v41  ;;  %v4663_v3 = vpack.c.bf16 %v4062_v7, %v4056_v17  ;;  %v4667_v17 = vpack.c.bf16 %v4101_v23, %v4092_v14 }
 0x4ec   : > { %v1875_v20 = vadd.f32 %v4151_v51, %v1874_v61  ;;  %v1896_v43 = vadd.f32 %v2683_v50, %v1895_v24  ;;  %v2707_v27 = vpop.eup %2706  ;;  %v4664_v61 = vld [vmem:[#allocation5_spill] sm:$0xff]  ;;  %v4670_v14 = vpack.c.bf16 %v4151_v51, %v4144_v15 }
 0x4ed   : > { %1966 = vmatpush1.bf16.msra.mxu1 %v4660_v21  ;;  %v2709_v44 = vpop.eup %2708  ;;  %v1948_v1 = vpack.c.bf16 %v2707_v27, %v2705_v57 }
 0x4ee   : > { %1967 = vmatprep.subr.bf16.mxu1 %v1936_v8  ;;  %v1876_v35 = vadd.f32 %v4159_v58, %v1875_v20  ;;  %v1897_v26 = vadd.f32 %v2685_v38, %v1896_v43  ;;  %v2711_v46 = vpop.eup %2710  ;;  %v4662_v38 = vpack.c.bf16 %v4050_v33, %v4043_v11  ;;  %v4665_v11 = vpack.c.bf16 %v4073_v45, %v4664_v61 }
 0x4ef   : > { %v1950_v0 = vpack.c.bf16 %v2711_v46, %v2709_v44  ;;  %v4668_v45 = vpack.c.bf16 %v4121_v29, %v4112_v48  ;;  %v4671_v48 = vpack.c.bf16 %v4167_v31, %v4159_v58 }
 0x4f0   : > { %v2713_v40 = vpop.eup %2712  ;;  %v1877_v9 = vadd.f32 %v4167_v31, %v1876_v35  ;;  %v1898_v12 = vadd.f32 %v2687_v18, %v1897_v26 }
 0x4f1   : > { %1968 = vmatpush1.bf16.msra.mxu1 %v4661_v16  ;;  %v2715_v50 = vpop.eup %2714 }
 0x4f2   : > { %1969 = vmatprep.subr.bf16.mxu1 %v1938_v49  ;;  %v2717_v8 = vpop.eup %2716  ;;  %v1878_v56 = vadd.f32 %v4172_v10, %v1877_v9  ;;  %v1899_v19 = vadd.f32 %v2689_v4, %v1898_v12  ;;  %v1952_v22 = vpack.c.bf16 %v2715_v50, %v2713_v40 }
 0x4f3   : > { %v2719_v53 = vpop.eup %2718 }
 0x4f4   : > { %v2721_v32 = vpop.eup %2720  ;;  %v1879_v59 = vadd.f32 %v4180_v52, %v1878_v56  ;;  %v1900_v42 = vadd.f32 %v2691_v39, %v1899_v19  ;;  %v1954_v30 = vpack.c.bf16 %v2719_v53, %v2717_v8  ;;  %v4666_v39 = vpack.c.bf16 %v4084_v2, %v4078_v62 }
 0x4f5   : > { %1970 = vmatpush1.bf16.msra.mxu1 %v4662_v38  ;;  %v2723_v18 = vpop.eup %2722  ;;  %v4669_v62 = vpack.c.bf16 %v4136_v28, %v4129_v25  ;;  %v4672_v25 = vpack.c.bf16 %v4180_v52, %v4172_v10  ;;  %v4673_v28 = vld [vmem:[#allocation8_spill] sm:$0xff] }
 0x4f6   : > { %1971 = vmatprep.subr.bf16.mxu1 %v1940_v63  ;;  %v1901_v49 = vadd.f32 %v2693_v13, %v1900_v42  ;;  %v1956_v55 = vpack.c.bf16 %v2723_v18, %v2721_v32  ;;  %v1880_v51 = vrot.slane %v1879_v59, 4 }
 0x4f8   : > { %v1902_v4 = vadd.f32 %v2695_v34, %v1901_v49  ;;  %v1881_v21 = vadd.f32 %v1880_v51, %v1879_v59 }
 0x4f9   : > { %1972 = vmatpush1.bf16.msra.mxu1 %v4663_v3 }
 0x4fa   : > { %1973 = vmatprep.subr.bf16.mxu1 %v1942_v36  ;;  %v1903_v5 = vadd.f32 %v2697_v60, %v1902_v4  ;;  %v1882_v20 = vrot.slane %v1881_v21, 2 }
 0x4fc   : > { %v1904_v33 = vadd.f32 %v2699_v47, %v1903_v5  ;;  %v1883_v31 = vadd.f32 %v1882_v20, %v1881_v21 }
 0x4fd   : > { %1974 = vmatpush1.bf16.msra.mxu1 %v4665_v11 }
 0x4fe   : > { %1975 = vmatprep.subr.bf16.mxu1 %v1944_v37  ;;  %v1905_v24 = vadd.f32 %v2701_v41, %v1904_v33  ;;  %v1302_v37 = vpack.c.bf16 %v4673_v28, %v4673_v28 }
 0x500   : > { %v1906_v13 = vadd.f32 %v2703_v6, %v1905_v24  ;;  %v4674_v6 = vmov 0.0  }
 0x501   : > { %1976 = vmatpush1.bf16.msra.mxu1 %v4666_v39 }
 0x502   : > { %1977 = vmatprep.subr.bf16.mxu1 %v1946_v54  ;;  %v1907_v63 = vadd.f32 %v2705_v57, %v1906_v13  ;;  %v1884_v54 = vrot.slane %v1883_v31, 1 }
 0x504   : > { %v1908_v7 = vadd.f32 %v2707_v27, %v1907_v63  ;;  %v2002_v12 = vpop.permute.xlu0 %2001 }
 0x505   : > { %1978 = vmatpush1.bf16.msra.mxu1 %v4667_v17 }
 0x506   : > { %1979 = vmatprep.subr.bf16.mxu1 %v1948_v1  ;;  %v1909_v34 = vadd.f32 %v2709_v44, %v1908_v7  ;;  %v1885_v44 = vadd.f32 %v1884_v54, %v1883_v31 }
 0x508   : > { %v1910_v60 = vadd.f32 %v2711_v46, %v1909_v34  ;;  %2724 = vrcp.f32 %v1885_v44 }
 0x509   : > { %1980 = vmatpush1.bf16.msra.mxu1 %v4668_v45 }
 0x50a   : > { %1981 = vmatprep.subr.bf16.mxu1 %v1950_v0  ;;  %v1911_v36 = vadd.f32 %v2713_v40, %v1910_v60  ;;  %v4675_v0 = vld [vmem:[#allocation11_spill] sm:$0xff] }
 0x50c   : > { %v1912_v2 = vadd.f32 %v2715_v50, %v1911_v36  ;;  %v4676_v50 = vld [vmem:[#allocation10_spill] sm:$0xff] }
 0x50d   : > { %1982 = vmatpush1.bf16.msra.mxu1 %v4669_v62 }
 0x50e   : > { %1983 = vmatprep.subr.bf16.mxu1 %v1952_v22  ;;  %v1913_v47 = vadd.f32 %v2717_v8, %v1912_v2  ;;  %v4677_v8 = vld [vmem:[#allocation9_spill] sm:$0xff] }
 0x510   : > { %v1914_v23 = vadd.f32 %v2719_v53, %v1913_v47 }
 0x511   : > { %1984 = vmatpush1.bf16.msra.mxu1 %v4670_v14 }
 0x512   : > { %1985 = vmatprep.subr.bf16.mxu1 %v1954_v30  ;;  %v1915_v41 = vadd.f32 %v2721_v32, %v1914_v23  ;;  %v2725_v10 = vpop.eup %2724 }
 0x514   : > { %v1916_v29 = vadd.f32 %v2723_v18, %v1915_v41 }
 0x515   : > { %1986 = vmatpush1.bf16.msra.mxu1 %v4671_v48 }
 0x516   : > { %1987 = vmatprep.subr.bf16.mxu1 %v1956_v55  ;;  %v1917_v15 = vrot.slane %v1916_v29, 4 }
 0x518   : > { %v1918_v57 = vadd.f32 %v1917_v15, %v1916_v29 }
 0x519   : > { %1988 = vmatpush1.bf16.msra.mxu1 %v4672_v25 }
 0x51a   : > { %v1919_v43 = vrot.slane %v1918_v57, 2 }
 0x51c   : > { %1990 = vmatmul.mubr.bf16.vlgmr.msra.gmra.mrb[76].mxu1 %v1302_v37  ;;  %v1920_v58 = vadd.f32 %v1919_v43, %v1918_v57 }
 0x51d   : > { %2069 = vmatprep.mubr.f32.mxu1 %v4674_v6 }
 0x51e   : > { %v1921_v27 = vrot.slane %v1920_v58, 1 }
 0x520   : > { %v1922_v35 = vadd.f32 %v1921_v27, %v1920_v58 }
 0x522   : > { %2726 = vrcp.f32 %v1922_v35 }
 0x52c   : > { %v2727_v26 = vpop.eup %2726 }
 0x5ef   : > { %v1991_v52 = vpop.f32.mrb[76].mxu1 }
 0x5f0   : > { %v1998_v1 = vmul.f32 %v2725_v10, %v1991_v52  ;;  %v1993_v46 = vpop.f32.mrb[77].mxu1 }
 0x5f1   : > { %v1999_v16 = vmul.f32 %v2727_v26, %v1993_v46  ;;  %v1995_v40 = vpop.f32.mrb[78].mxu1 }
 0x5f2   : > { %v1996_v9 = vpop.f32.mrb[79].mxu1 }
 0x5f3   : > { %2005 = vmatprep.subr.mxu1 %v1999_v16 }
 0x5f4   : > { %2006 = vmatpush1.msra.mxu1 %v1998_v1 }
 0x5f5   : > { %2078 = vmatprep.subr.mxu1 %v4675_v0  ;;  %2394 = vmatmul.mubr.msk.f32.vlgmr.msra.gmra.mrb[80].mxu1 %vm633_vm2, %v2002_v12 }
 0x5f6   : > { %2079 = vmatpush1.msra.mxu1 %v4676_v50  ;;  %2142 = vmatprep.mubr.f32.mxu1 %v4674_v6 }
 0x5fd   : > { %2395 = vmatmul.mubr.msk.f32.vlgmr.msra.gmra.mrb[80].mxu1 %vm633_vm2, %v4677_v8 }
 0x6d0   : > { %v2144_v56 = vpop.f32.mrb[80].mxu1 }
 0x6d1   : > { %v2161_v19 = vmul.f32 %v2144_v56, %v2144_v56  ;;  %v2146_v22 = vpop.f32.mrb[81].mxu1  ;;  %v2154_v53 = vsel %vm347_vm0, %v2144_v56, 0.0 }
 0x6d2   : > { %v2151_v38 = vcombine.low %v2144_v56, %v2146_v22  ;;  %v2155_v32 = vsel %vm347_vm0, %v2146_v22, 0.0  ;;  %v2162_v59 = vmul.f32 %v2146_v22, %v2146_v22 }
 0x6d3   : > { %v2156_v42 = vadd.f32 %v2155_v32, %v2154_v53  ;;  %v2163_v30 = vsel %vm347_vm0, %v2161_v19, 0.0 }
 0x6d4   : > { %v2164_v18 = vsel %vm347_vm0, %v2162_v59, 0.0  ;;  %2153 = vst [vmem:[%s290_s8] sm:$0xff] %v2151_v38 }
 0x6d5   : > { %2157 = vadd.xlane.f32.xlu1 %v2156_v42  ;;  %v2165_v49 = vadd.f32 %v2164_v18, %v2163_v30 }
 0x6d7   : > { %2166 = vadd.xlane.f32.xlu0 %v2165_v49 }
 0x6d8   : > { %2741 = shalt.err (!%p2738_p5)
}
 0x6d9   : > { %s2742_s27 = scalar_lea.hbm %s4323_s17, 128  ;;  %s2746_s10 = scalar_lea.hbm %s4376_s5, 256 }
 0x6da   : > { %p2743_p6 = scmp.ne.s32.totalorder %s4323_s17, %s2742_s27  ;;  %p2747_p10 = scmp.lt.u32.totalorder %s4323_s17, %s4376_s5 }
 0x6db   : > { %p2748_p11 = scmp.lt.u32.totalorder %s2746_s10, %s2742_s27  ;;  %p2750_p13 = scmp.lt.u32.totalorder %s2742_s27, %s4323_s17 }
 0x6dc   : > { %p2744_p7 = pnand %p2743_p6, %p2892_p4 }
 0x6dd   : > { %p2749_p12 = por %p2748_p11, %p2747_p10 }
 0x6de   : > { %p2745_p9 = pneg %p2744_p7 }
 0x6df   : > { %p2751_p0 = por %p2750_p13, %p2749_p12 }
 0x6e1   : > { %p2752_p1 = pnand %p2751_p0, %p2745_p9 }
 0x6e3   : > { %2755 = shalt.err (!%p2752_p1)
}
 0x6e4   : > { %2405 = dma.vmem_to_hbm [thread:$0]  (%p2892_p4), %s2201_s18, 128, %s4323_s17, %s2170_s19   ;;  %vm2159_vm3 = vcmask 3072  }
 0x6e5   : > { %s2346_s20 = sshll.u32 %s2910_s15, 2 }
 0x6e6   : > { %s321_s30 = scalar_lea.vmem %s4377_s6, %s2346_s20  ;;  %s328_s10 = scalar_lea.vmem %s4378_s7, %s2346_s20 }
 0x762   : > { %v2158_v55 = vpop.xlane.xlu1 %2157 }
 0x763   : > { %2160 = vst.msk [vmem:[%s321_s30] sm:$0xf] %vm2159_vm3, %v2158_v55 }
 0x764   : > { %v2167_v3 = vpop.xlane.xlu0 %2166 }
 0x765   : > { %2168 = vst.msk [vmem:[%s328_s10] sm:$0xf] %vm2159_vm3, %v2167_v3 }
 0x766 PF: > { %p2411_p2 = scmp.ge.s32.totalorder %s2806_s29, 2  ;;  %s2218_s11 = sand.u32 1, %s2786_s24  }
 0x767   : > { %s2219_s15 = scalar_lea.sflag [#allocation3], %s2218_s11 }
 0x768   : > { %p2408_p4 = pnand %p2411_p2, %p2899_p8 }
 0x76a   : > { %2781 = dma.done.wait (!%p2408_p4), %s2219_s15, 128  }
 0x76b   : > { %2783 = vsyncadd (!%p2408_p4), %s2219_s15, 4294967168  ;;  %s21_s29 = sadd.s32 1, %s2806_s29   ;;  %s4678_s24 = smov %s2790_s25 }
 0x76c   : > { %p18_p3 = scmp.ge.s32.totalorder %s21_s29, 4   ;;  %s4679_s25 = smov %s2794_s26 }
 0x76d   : > { %s4680_s26 = smov %s2905_s14  ;;  %s4681_s27 = smov %s2802_s28 }
 0x76e   : > { %s4682_s28 = smov %s4684_s9  ;;  %20 = sbr.rel (!%p18_p3) target bundleno = 4 (0x4), region = 99 }
 0x775   :  { %2244 = vsyncpa [#allocation3], 1 }
 0x776   :  { %2246 = vsyncpa [#allocation3 + $0x1], 1 }

</bundles_post_ra>
